<compile_context>
chip_gen: v7x
topology: tpu7x:2x2x1
jax: 0.10.0
libtpu: 0.0.40
codegen_flags: <defaults>
</compile_context>

<pallas_src>
import math

import jax
import jax.numpy as jnp
from jax.experimental import pallas as pl
from jax.experimental.pallas import tpu as pltpu

D_MODEL = 32
NHEAD = 4
HEAD_DIM = D_MODEL // NHEAD
LN_EPS = 1e-5


# ----------------------------------------------------------------------------
# Kernel helpers
# ----------------------------------------------------------------------------
def _layer_norm(y, g, b):
    """One-pass LayerNorm: var = E[y^2] - E[y]^2 (biased, like torch)."""
    mu = jnp.mean(y, axis=-1, keepdims=True)
    ms = jnp.mean(y * y, axis=-1, keepdims=True)
    var = ms - mu * mu
    return (y - mu) * jax.lax.rsqrt(var + LN_EPS) * g + b


# ----------------------------------------------------------------------------
# Per-layer kernel: flash-style attention over the S axis + merge/MLP epilogue
# ----------------------------------------------------------------------------
def _encoder_layer_kernel(x_ref, src_ref, val_ref,
                          wq_ref, wk_ref, wv_ref, wm_ref,
                          g1_ref, b1_ref, w1a_ref, w1b_ref, w2_ref,
                          g2_ref, b2_ref,
                          out_ref,
                          q_sc, m_sc, l_sc, acc_sc):
    si = pl.program_id(2)

    # ---- init (first S tile): query projection + online-softmax state ------
    @pl.when(si == 0)
    def _init():
        x = x_ref[0].astype(jnp.float32)                           # [tL, C]
        q = jnp.dot(x, wq_ref[...], preferred_element_type=jnp.float32)
        q_sc[...] = q.astype(jnp.bfloat16)          # softmax scale folded in Wq
        m_sc[...] = jnp.full_like(m_sc, -jnp.inf)
        l_sc[...] = jnp.zeros_like(l_sc)
        acc_sc[...] = jnp.zeros_like(acc_sc)

    # ---- K/V projection for this S tile (lane-dense 2-D matmuls) -----------
    src = src_ref[0].astype(jnp.float32)                           # [tS, C]
    val = val_ref[0].astype(jnp.float32)                           # [tS, C]
    k = jnp.dot(src, wk_ref[...],
                preferred_element_type=jnp.float32).astype(jnp.bfloat16)
    v = jnp.dot(val, wv_ref[...],
                preferred_element_type=jnp.float32).astype(jnp.bfloat16)
    q = q_sc[...]                                                  # [tL, C] bf16

    # ---- per-head flash update (NHEAD = 4, statically unrolled) ------------
    for h in range(NHEAD):
        sl = slice(h * HEAD_DIM, (h + 1) * HEAD_DIM)
        s_h = jax.lax.dot_general(                                 # q_h @ k_h^T
            q[:, sl], k[:, sl], (((1,), (1,)), ((), ())),
            preferred_element_type=jnp.float32)                    # [tL, tS] f32
        m_prev = m_sc[h]                                           # [tL, 1]
        m_new = jnp.maximum(m_prev, jnp.max(s_h, axis=-1, keepdims=True))
        alpha = jnp.exp(m_prev - m_new)
        p_h = jnp.exp(s_h - m_new)
        l_sc[h] = alpha * l_sc[h] + jnp.sum(p_h, axis=-1, keepdims=True)
        pv_h = jnp.dot(p_h.astype(jnp.bfloat16), v[:, sl],
                       preferred_element_type=jnp.float32)         # [tL, D]
        acc_sc[h] = alpha * acc_sc[h] + pv_h
        m_sc[h] = m_new

    # ---- finalize (last S tile): merge heads, LN, MLP, residual ------------
    @pl.when(si == pl.num_programs(2) - 1)
    def _finalize():
        x = x_ref[0].astype(jnp.float32)                           # [tL, C]
        # head-merge + merge projection fused into one [tL,32]@[32,32] matmul
        msg2d = jnp.concatenate(
            [acc_sc[h] * pl.reciprocal(l_sc[h], approx=True)
             for h in range(NHEAD)], axis=-1)                      # [tL, C]
        merged = jnp.dot(msg2d, wm_ref[...],
                         preferred_element_type=jnp.float32)
        msg = _layer_norm(merged, g1_ref[...], b1_ref[...])

        # MLP on concat([x, msg]) without the concat: relu(x@W1a + msg@W1b)@W2
        h1 = jnp.maximum(
            jnp.dot(x, w1a_ref[...], preferred_element_type=jnp.float32)
            + jnp.dot(msg, w1b_ref[...], preferred_element_type=jnp.float32),
            0.0)
        m2 = jnp.dot(h1, w2_ref[...], preferred_element_type=jnp.float32)
        m2 = _layer_norm(m2, g2_ref[...], b2_ref[...])
        out_ref[0] = (x + m2).astype(out_ref.dtype)


# ----------------------------------------------------------------------------
# Wrapper-side helpers
# ----------------------------------------------------------------------------
def _pick_tile(dim, target):
    """Largest multiple-of-8 divisor of `dim` that is <= target (or full dim)."""
    if dim <= target:
        return dim
    t = (min(target, dim) // 8) * 8
    while t >= 8:
        if dim % t == 0:
            return t
        t -= 8
    return dim


def _vmem_limit_bytes(tL, tS, C):
    f32 = 4
    tiles = 2 * 2 * (tL * C + 2 * tS * C) * f32     # double-buffered x/src/val + out
    weights = 32 * C * 128 * f32                    # resident weights (lane-padded)
    scratch = tL * C * 2 + 3 * NHEAD * tL * 128 * f32
    temps = 8 * tL * tS * f32                       # live per-head scores / probs
    est = tiles + weights + scratch + temps
    return int(min(max(2 * est, 32 * 1024 * 1024), 64 * 1024 * 1024))


def _prepare_layer_params(params):
    """Raw (wq, wk, wv, wm, g1, b1, w1, w2, g2, b2) -> kernel-friendly tensors.

    Weights stay lane-dense 2-D ([in, out]).  The 1/sqrt(head_dim) softmax
    scale is folded into Wq; W1 is split so the x/message concat is skipped.
    """
    wq, wk, wv, wm, g1, b1, w1, w2, g2, b2 = params
    C = wq.shape[0]
    wq_s = wq * (1.0 / math.sqrt(HEAD_DIM))
    w1a, w1b = w1[:C], w1[C:]
    return (wq_s, wk, wv, wm, g1, b1, w1a, w1b, w2, g2, b2)


def _encoder_layer(x, src, val, prepped, *, q_tile, kv_tile):
    N, L, C = x.shape
    S = src.shape[1]
    tL = _pick_tile(L, q_tile)
    tS = _pick_tile(S, kv_tile)

    wspec = pl.BlockSpec(memory_space=pltpu.MemorySpace.VMEM)  # whole-array resident
    in_specs = [
        pl.BlockSpec((1, tL, C), lambda b, qi, si: (b, qi, 0)),   # query tile
        pl.BlockSpec((1, tS, C), lambda b, qi, si: (b, si, 0)),   # key source tile
        pl.BlockSpec((1, tS, C), lambda b, qi, si: (b, si, 0)),   # value source tile
    ] + [wspec] * 11

    return pl.pallas_call(
        _encoder_layer_kernel,
        out_shape=jax.ShapeDtypeStruct((N, L, C), x.dtype),
        grid=(N, L // tL, S // tS),
        in_specs=in_specs,
        out_specs=pl.BlockSpec((1, tL, C), lambda b, qi, si: (b, qi, 0)),
        scratch_shapes=[
            pltpu.VMEM((tL, C), jnp.bfloat16),                # scaled query
            pltpu.VMEM((NHEAD, tL, 1), jnp.float32),          # running max
            pltpu.VMEM((NHEAD, tL, 1), jnp.float32),          # running denom
            pltpu.VMEM((NHEAD, tL, HEAD_DIM), jnp.float32),   # running output
        ],
        compiler_params=pltpu.CompilerParams(
            dimension_semantics=("parallel", "parallel", "arbitrary"),
            vmem_limit_bytes=_vmem_limit_bytes(tL, tS, C)),
    )(x, src, val, *prepped)


# ----------------------------------------------------------------------------
# LocalFeatureTransformer_improved forward (one pallas_call per layer)
# ----------------------------------------------------------------------------
def local_feature_transformer(feat0, feat1=None, feat2=None,
                              mask0=None, mask1=None, *,
                              layer_names, layer_params,
                              attention="full",
                              q_tile=256, kv_tile=512):
    """Forward pass of LocalFeatureTransformer_improved.

    q_tile / kv_tile: query / key-value tile sizes.  On v7x (64 MiB VMEM,
    2 TensorCores) use roughly half the v5e/v6e query tile (e.g. q_tile=128).
    """
    assert feat0.shape[2] == D_MODEL, \
        "the feature number of src and transformer must be equal"
    assert attention == "full", \
        "only FullAttention implemented"   # TODO(synk): linear/learned/cosine
    assert mask0 is None and mask1 is None, \
        "masks are not supported"          # TODO(synk): q_mask / kv_mask

    feat = feat0
    for name, params in zip(layer_names, layer_params):
        prepped = _prepare_layer_params(params)
        if name == "self":
            src, val = feat, feat
        elif name == "cross":
            src = feat1
            val = feat2 if feat2 is not None else feat1
        else:
            raise KeyError(name)
        feat = _encoder_layer(feat, src, val, prepped,
                              q_tile=q_tile, kv_tile=kv_tile)
    return feat


# ----------------------------------------------------------------------------
# Parameter init (mirrors _reset_parameters: xavier on dim>1, LN default)
# ----------------------------------------------------------------------------
def _xavier_uniform_t(key, out_dim, in_dim):
    limit = math.sqrt(6.0 / (in_dim + out_dim))
    w = jax.random.uniform(key, (out_dim, in_dim), jnp.float32, -limit, limit)
    return w.T  # pre-transposed to [in, out]


def init_layer_params(key, d_model):
    ks = jax.random.split(key, 6)
    wq = _xavier_uniform_t(ks[0], d_model, d_model)
    wk = _xavier_uniform_t(ks[1], d_model, d_model)
    wv = _xavier_uniform_t(ks[2], d_model, d_model)
    wm = _xavier_uniform_t(ks[3], d_model, d_model)
    w1 = _xavier_uniform_t(ks[4], 2 * d_model, 2 * d_model)
    w2 = _xavier_uniform_t(ks[5], d_model, 2 * d_model)
    g1 = jnp.ones((1, d_model), jnp.float32)
    b1 = jnp.zeros((1, d_model), jnp.float32)
    g2 = jnp.ones((1, d_model), jnp.float32)
    b2 = jnp.zeros((1, d_model), jnp.float32)
    return (wq, wk, wv, wm, g1, b1, w1, w2, g2, b2)


# ----------------------------------------------------------------------------
# Pure-JAX f32 reference (raw params, same math) for a sanity check
# ----------------------------------------------------------------------------
def _ln_ref(x, g, b):
    mu = jnp.mean(x, axis=-1, keepdims=True)
    var = jnp.mean((x - mu) ** 2, axis=-1, keepdims=True)
    return (x - mu) * jax.lax.rsqrt(var + LN_EPS) * g + b


def _layer_ref(x, source, value_src, params):
    wq, wk, wv, wm, g1, b1, w1, w2, g2, b2 = params
    N, L, C = x.shape
    S = source.shape[1]
    q = (x @ wq).reshape(N, L, NHEAD, HEAD_DIM)
    k = (source @ wk).reshape(N, S, NHEAD, HEAD_DIM)
    v = (value_src @ wv).reshape(N, S, NHEAD, HEAD_DIM)
    sc = jnp.einsum("nlhd,nshd->nlsh", q, k) / math.sqrt(HEAD_DIM)
    a = jax.nn.softmax(sc, axis=2)
    msg = jnp.einsum("nlsh,nshd->nlhd", a, v).reshape(N, L, C)
    msg = _ln_ref(msg @ wm, g1[0], b1[0])
    cat = jnp.concatenate([x, msg], axis=-1)
    msg = _ln_ref(jnp.maximum(cat @ w1, 0.0) @ w2, g2[0], b2[0])
    return x + msg


def _transformer_ref(feat0, feat1, feat2, layer_names, layer_params):
    for params, name in zip(layer_params, layer_names):
        if name == "self":
            feat0 = _layer_ref(feat0, feat0, feat0, params)
        else:
            value = feat2 if feat2 is not None else feat1
            feat0 = _layer_ref(feat0, feat1, value, params)
    return feat0


# ----------------------------------------------------------------------------
if __name__ == "__main__":
    N, L, S = 2, 16, 16
    layer_names = ["self", "cross"]

    root = jax.random.PRNGKey(0)
    k_in, k_par = jax.random.split(root)
    k0, k1, k2 = jax.random.split(k_in, 3)
    feat0 = jax.random.normal(k0, (N, L, D_MODEL), jnp.float32)
    feat1 = jax.random.normal(k1, (N, S, D_MODEL), jnp.float32)
    feat2 = jax.random.normal(k2, (N, S, D_MODEL), jnp.float32)

    layer_params = [init_layer_params(k, D_MODEL)
                    for k in jax.random.split(k_par, len(layer_names))]

    out = local_feature_transformer(feat0, feat1, feat2,
                                    layer_names=layer_names,
                                    layer_params=layer_params)
    out = jax.block_until_ready(out)

    ref = _transformer_ref(feat0, feat1, feat2, layer_names, layer_params)
    assert out.shape == (N, L, D_MODEL)
    # bf16 operands feed the two O(L*S) matmuls -> relaxed tolerance vs f32 ref
    assert jnp.allclose(out, ref, rtol=2e-2, atol=2e-2), \
        f"max abs diff {jnp.max(jnp.abs(out - ref))}"

    print("KERNEL_OK")
</pallas_src>

<mosaic_0001>
module attributes {stable_mosaic.version = 11 : i64} {
  func.func @_encoder_layer_kernel(%arg0: i32, %arg1: i32, %arg2: i32, %arg3: memref<1x16x32xf32, #tpu.memory_space<vmem>>, %arg4: memref<1x16x32xf32, #tpu.memory_space<vmem>>, %arg5: memref<1x16x32xf32, #tpu.memory_space<vmem>>, %arg6: memref<32x32xf32, #tpu.memory_space<vmem>>, %arg7: memref<32x32xf32, #tpu.memory_space<vmem>>, %arg8: memref<32x32xf32, #tpu.memory_space<vmem>>, %arg9: memref<32x32xf32, #tpu.memory_space<vmem>>, %arg10: memref<1x32xf32, #tpu.memory_space<vmem>>, %arg11: memref<1x32xf32, #tpu.memory_space<vmem>>, %arg12: memref<32x64xf32, #tpu.memory_space<vmem>>, %arg13: memref<32x64xf32, #tpu.memory_space<vmem>>, %arg14: memref<64x32xf32, #tpu.memory_space<vmem>>, %arg15: memref<1x32xf32, #tpu.memory_space<vmem>>, %arg16: memref<1x32xf32, #tpu.memory_space<vmem>>, %arg17: memref<1x16x32xf32, #tpu.memory_space<vmem>>, %arg18: memref<16x32xbf16, #tpu.memory_space<vmem>>, %arg19: memref<4x16x1xf32, #tpu.memory_space<vmem>>, %arg20: memref<4x16x1xf32, #tpu.memory_space<vmem>>, %arg21: memref<4x16x8xf32, #tpu.memory_space<vmem>>) attributes {dimension_semantics = [#tpu.dimension_semantics<parallel>, #tpu.dimension_semantics<parallel>, #tpu.dimension_semantics<arbitrary>], iteration_bounds = array<i64: 2, 1, 1>, scalar_prefetch = 0 : i64, scratch_operands = 4 : i64, tpu.core_type = #tpu.core_type<tc>, window_params = [{transform_indices = @transform_0, window_bounds = array<i64: 1, 16, 32>}, {transform_indices = @transform_1, window_bounds = array<i64: 1, 16, 32>}, {transform_indices = @transform_2, window_bounds = array<i64: 1, 16, 32>}, {pipeline_mode = #tpu.pipeline_mode<synchronous>, transform_indices = @transform_3, window_bounds = array<i64: 32, 32>}, {pipeline_mode = #tpu.pipeline_mode<synchronous>, transform_indices = @transform_4, window_bounds = array<i64: 32, 32>}, {pipeline_mode = #tpu.pipeline_mode<synchronous>, transform_indices = @transform_5, window_bounds = array<i64: 32, 32>}, {pipeline_mode = #tpu.pipeline_mode<synchronous>, transform_indices = @transform_6, window_bounds = array<i64: 32, 32>}, {pipeline_mode = #tpu.pipeline_mode<synchronous>, transform_indices = @transform_7, window_bounds = array<i64: 1, 32>}, {pipeline_mode = #tpu.pipeline_mode<synchronous>, transform_indices = @transform_8, window_bounds = array<i64: 1, 32>}, {pipeline_mode = #tpu.pipeline_mode<synchronous>, transform_indices = @transform_9, window_bounds = array<i64: 32, 64>}, {pipeline_mode = #tpu.pipeline_mode<synchronous>, transform_indices = @transform_10, window_bounds = array<i64: 32, 64>}, {pipeline_mode = #tpu.pipeline_mode<synchronous>, transform_indices = @transform_11, window_bounds = array<i64: 64, 32>}, {pipeline_mode = #tpu.pipeline_mode<synchronous>, transform_indices = @transform_12, window_bounds = array<i64: 1, 32>}, {pipeline_mode = #tpu.pipeline_mode<synchronous>, transform_indices = @transform_13, window_bounds = array<i64: 1, 32>}, {transform_indices = @transform_14, window_bounds = array<i64: 1, 16, 32>}]} {
    %c0_i32 = arith.constant 0 : i32
    %0 = arith.cmpi eq, %arg2, %c0_i32 : i32
    %1 = arith.extui %0 : i1 to i32
    %c0_i32_0 = arith.constant 0 : i32
    %2 = arith.cmpi ne, %1, %c0_i32_0 : i32
    scf.if %2 {
      %c0_100 = arith.constant 0 : index
      %c0_101 = arith.constant 0 : index
      %c0_102 = arith.constant 0 : index
      %161 = vector.load %arg3[%c0_100, %c0_101, %c0_102] : memref<1x16x32xf32, #tpu.memory_space<vmem>>, vector<1x16x32xf32>
      %162 = vector.shape_cast %161 : vector<1x16x32xf32> to vector<16x32xf32>
      %c0_103 = arith.constant 0 : index
      %c0_104 = arith.constant 0 : index
      %163 = vector.load %arg6[%c0_103, %c0_104] : memref<32x32xf32, #tpu.memory_space<vmem>>, vector<32x32xf32>
      %cst_105 = arith.constant dense<0.000000e+00> : vector<16x32xf32>
      %164 = tpu.matmul %162, %163, %cst_105 {dimension_numbers = #tpu.dot_dimension_numbers<[1], [0], [0], [1], [0, 0, 1, 1], [], []>} : vector<16x32xf32>, vector<32x32xf32>, vector<16x32xf32> -> vector<16x32xf32>
      %165 = arith.truncf %164 : vector<16x32xf32> to vector<16x32xbf16>
      %c0_106 = arith.constant 0 : index
      %c0_107 = arith.constant 0 : index
      %166 = vector.load %arg18[%c0_106, %c0_107] : memref<16x32xbf16, #tpu.memory_space<vmem>>, vector<16x32xbf16>
      tpu.vector_store %arg18[%c0_106, %c0_107], %165 {strides = array<i32>} : memref<16x32xbf16, #tpu.memory_space<vmem>>, vector<16x32xbf16>,
      %cst_108 = arith.constant 0xFF800000 : f32
      %167 = vector.broadcast %cst_108 : f32 to vector<4x16x1xf32>
      %c0_109 = arith.constant 0 : index
      %c0_110 = arith.constant 0 : index
      %c0_111 = arith.constant 0 : index
      %168 = vector.load %arg19[%c0_109, %c0_110, %c0_111] : memref<4x16x1xf32, #tpu.memory_space<vmem>>, vector<4x16x1xf32>
      tpu.vector_store %arg19[%c0_109, %c0_110, %c0_111], %167 {strides = array<i32>} : memref<4x16x1xf32, #tpu.memory_space<vmem>>, vector<4x16x1xf32>,
      %cst_112 = arith.constant 0.000000e+00 : f32
      %169 = vector.broadcast %cst_112 : f32 to vector<4x16x1xf32>
      %c0_113 = arith.constant 0 : index
      %c0_114 = arith.constant 0 : index
      %c0_115 = arith.constant 0 : index
      %170 = vector.load %arg20[%c0_113, %c0_114, %c0_115] : memref<4x16x1xf32, #tpu.memory_space<vmem>>, vector<4x16x1xf32>
      tpu.vector_store %arg20[%c0_113, %c0_114, %c0_115], %169 {strides = array<i32>} : memref<4x16x1xf32, #tpu.memory_space<vmem>>, vector<4x16x1xf32>,
      %cst_116 = arith.constant 0.000000e+00 : f32
      %171 = vector.broadcast %cst_116 : f32 to vector<4x16x8xf32>
      %c0_117 = arith.constant 0 : index
      %c0_118 = arith.constant 0 : index
      %c0_119 = arith.constant 0 : index
      %172 = vector.load %arg21[%c0_117, %c0_118, %c0_119] : memref<4x16x8xf32, #tpu.memory_space<vmem>>, vector<4x16x8xf32>
      tpu.vector_store %arg21[%c0_117, %c0_118, %c0_119], %171 {strides = array<i32>} : memref<4x16x8xf32, #tpu.memory_space<vmem>>, vector<4x16x8xf32>,
    } else {
    }
    %c0 = arith.constant 0 : index
    %c0_1 = arith.constant 0 : index
    %c0_2 = arith.constant 0 : index
    %3 = vector.load %arg4[%c0, %c0_1, %c0_2] : memref<1x16x32xf32, #tpu.memory_space<vmem>>, vector<1x16x32xf32>
    %4 = vector.shape_cast %3 : vector<1x16x32xf32> to vector<16x32xf32>
    %c0_3 = arith.constant 0 : index
    %c0_4 = arith.constant 0 : index
    %c0_5 = arith.constant 0 : index
    %5 = vector.load %arg5[%c0_3, %c0_4, %c0_5] : memref<1x16x32xf32, #tpu.memory_space<vmem>>, vector<1x16x32xf32>
    %6 = vector.shape_cast %5 : vector<1x16x32xf32> to vector<16x32xf32>
    %c0_6 = arith.constant 0 : index
    %c0_7 = arith.constant 0 : index
    %7 = vector.load %arg7[%c0_6, %c0_7] : memref<32x32xf32, #tpu.memory_space<vmem>>, vector<32x32xf32>
    %cst = arith.constant dense<0.000000e+00> : vector<16x32xf32>
    %8 = tpu.matmul %4, %7, %cst {dimension_numbers = #tpu.dot_dimension_numbers<[1], [0], [0], [1], [0, 0, 1, 1], [], []>} : vector<16x32xf32>, vector<32x32xf32>, vector<16x32xf32> -> vector<16x32xf32>
    %9 = arith.truncf %8 : vector<16x32xf32> to vector<16x32xbf16>
    %c0_8 = arith.constant 0 : index
    %c0_9 = arith.constant 0 : index
    %10 = vector.load %arg8[%c0_8, %c0_9] : memref<32x32xf32, #tpu.memory_space<vmem>>, vector<32x32xf32>
    %cst_10 = arith.constant dense<0.000000e+00> : vector<16x32xf32>
    %11 = tpu.matmul %6, %10, %cst_10 {dimension_numbers = #tpu.dot_dimension_numbers<[1], [0], [0], [1], [0, 0, 1, 1], [], []>} : vector<16x32xf32>, vector<32x32xf32>, vector<16x32xf32> -> vector<16x32xf32>
    %12 = arith.truncf %11 : vector<16x32xf32> to vector<16x32xbf16>
    %c0_11 = arith.constant 0 : index
    %c0_12 = arith.constant 0 : index
    %13 = vector.load %arg18[%c0_11, %c0_12] : memref<16x32xbf16, #tpu.memory_space<vmem>>, vector<16x32xbf16>
    %14 = vector.extract_strided_slice %13 {offsets = [0, 0], sizes = [16, 8], strides = [1, 1]} : vector<16x32xbf16> to vector<16x8xbf16>
    %15 = vector.extract_strided_slice %9 {offsets = [0, 0], sizes = [16, 8], strides = [1, 1]} : vector<16x32xbf16> to vector<16x8xbf16>
    %cst_13 = arith.constant dense<0.000000e+00> : vector<16x16xf32>
    %16 = tpu.matmul %14, %15, %cst_13 {dimension_numbers = #tpu.dot_dimension_numbers<[1], [1], [0], [0], [0, 0, 1, 0], [], []>} : vector<16x8xbf16>, vector<16x8xbf16>, vector<16x16xf32> -> vector<16x16xf32>
    %c0_14 = arith.constant 0 : index
    %c0_15 = arith.constant 0 : index
    %c0_16 = arith.constant 0 : index
    %17 = vector.load %arg19[%c0_14, %c0_15, %c0_16] : memref<4x16x1xf32, #tpu.memory_space<vmem>>, vector<1x16x1xf32>
    %18 = vector.shape_cast %17 : vector<1x16x1xf32> to vector<16x1xf32>
    %cst_17 = arith.constant dense<0xFF800000> : vector<16xf32>
    %19 = vector.multi_reduction <maximumf>, %16, %cst_17 [1] : vector<16x16xf32> to vector<16xf32>
    %20 = vector.shape_cast %19 : vector<16xf32> to vector<16x1xf32>
    %21 = arith.maximumf %18, %20 : vector<16x1xf32>
    %22 = arith.subf %18, %21 : vector<16x1xf32>
    %23 = math.exp %22 : vector<16x1xf32>
    %24 = vector.broadcast %21 : vector<16x1xf32> to vector<16x16xf32>
    %25 = arith.subf %16, %24 : vector<16x16xf32>
    %26 = math.exp %25 : vector<16x16xf32>
    %c0_18 = arith.constant 0 : index
    %c0_19 = arith.constant 0 : index
    %c0_20 = arith.constant 0 : index
    %27 = vector.load %arg20[%c0_18, %c0_19, %c0_20] : memref<4x16x1xf32, #tpu.memory_space<vmem>>, vector<1x16x1xf32>
    %28 = vector.shape_cast %27 : vector<1x16x1xf32> to vector<16x1xf32>
    %29 = arith.mulf %23, %28 : vector<16x1xf32>
    %cst_21 = arith.constant dense<0.000000e+00> : vector<16xf32>
    %30 = vector.multi_reduction <add>, %26, %cst_21 [1] : vector<16x16xf32> to vector<16xf32>
    %31 = vector.shape_cast %30 : vector<16xf32> to vector<16x1xf32>
    %32 = arith.addf %29, %31 : vector<16x1xf32>
    %c0_22 = arith.constant 0 : index
    %c0_23 = arith.constant 0 : index
    %c0_24 = arith.constant 0 : index
    %33 = vector.load %arg20[%c0_22, %c0_23, %c0_24] : memref<4x16x1xf32, #tpu.memory_space<vmem>>, vector<1x16x1xf32>
    %34 = vector.shape_cast %33 : vector<1x16x1xf32> to vector<16x1xf32>
    %35 = vector.shape_cast %32 : vector<16x1xf32> to vector<1x16x1xf32>
    tpu.vector_store %arg20[%c0_22, %c0_23, %c0_24], %35 {strides = array<i32>} : memref<4x16x1xf32, #tpu.memory_space<vmem>>, vector<1x16x1xf32>,
    %36 = arith.truncf %26 : vector<16x16xf32> to vector<16x16xbf16>
    %37 = vector.extract_strided_slice %12 {offsets = [0, 0], sizes = [16, 8], strides = [1, 1]} : vector<16x32xbf16> to vector<16x8xbf16>
    %cst_25 = arith.constant dense<0.000000e+00> : vector<16x8xf32>
    %38 = tpu.matmul %36, %37, %cst_25 {dimension_numbers = #tpu.dot_dimension_numbers<[1], [0], [0], [1], [0, 0, 1, 1], [], []>} : vector<16x16xbf16>, vector<16x8xbf16>, vector<16x8xf32> -> vector<16x8xf32>
    %c0_26 = arith.constant 0 : index
    %c0_27 = arith.constant 0 : index
    %c0_28 = arith.constant 0 : index
    %39 = vector.load %arg21[%c0_26, %c0_27, %c0_28] : memref<4x16x8xf32, #tpu.memory_space<vmem>>, vector<1x16x8xf32>
    %40 = vector.shape_cast %39 : vector<1x16x8xf32> to vector<16x8xf32>
    %41 = vector.broadcast %23 : vector<16x1xf32> to vector<16x8xf32>
    %42 = arith.mulf %41, %40 : vector<16x8xf32>
    %43 = arith.addf %42, %38 : vector<16x8xf32>
    %c0_29 = arith.constant 0 : index
    %c0_30 = arith.constant 0 : index
    %c0_31 = arith.constant 0 : index
    %44 = vector.load %arg21[%c0_29, %c0_30, %c0_31] : memref<4x16x8xf32, #tpu.memory_space<vmem>>, vector<1x16x8xf32>
    %45 = vector.shape_cast %44 : vector<1x16x8xf32> to vector<16x8xf32>
    %46 = vector.shape_cast %43 : vector<16x8xf32> to vector<1x16x8xf32>
    tpu.vector_store %arg21[%c0_29, %c0_30, %c0_31], %46 {strides = array<i32>} : memref<4x16x8xf32, #tpu.memory_space<vmem>>, vector<1x16x8xf32>,
    %c0_32 = arith.constant 0 : index
    %c0_33 = arith.constant 0 : index
    %c0_34 = arith.constant 0 : index
    %47 = vector.load %arg19[%c0_32, %c0_33, %c0_34] : memref<4x16x1xf32, #tpu.memory_space<vmem>>, vector<1x16x1xf32>
    %48 = vector.shape_cast %47 : vector<1x16x1xf32> to vector<16x1xf32>
    %49 = vector.shape_cast %21 : vector<16x1xf32> to vector<1x16x1xf32>
    tpu.vector_store %arg19[%c0_32, %c0_33, %c0_34], %49 {strides = array<i32>} : memref<4x16x1xf32, #tpu.memory_space<vmem>>, vector<1x16x1xf32>,
    %50 = vector.extract_strided_slice %13 {offsets = [0, 8], sizes = [16, 8], strides = [1, 1]} : vector<16x32xbf16> to vector<16x8xbf16>
    %51 = vector.extract_strided_slice %9 {offsets = [0, 8], sizes = [16, 8], strides = [1, 1]} : vector<16x32xbf16> to vector<16x8xbf16>
    %cst_35 = arith.constant dense<0.000000e+00> : vector<16x16xf32>
    %52 = tpu.matmul %50, %51, %cst_35 {dimension_numbers = #tpu.dot_dimension_numbers<[1], [1], [0], [0], [0, 0, 1, 0], [], []>} : vector<16x8xbf16>, vector<16x8xbf16>, vector<16x16xf32> -> vector<16x16xf32>
    %c1 = arith.constant 1 : index
    %c0_36 = arith.constant 0 : index
    %c0_37 = arith.constant 0 : index
    %53 = vector.load %arg19[%c1, %c0_36, %c0_37] : memref<4x16x1xf32, #tpu.memory_space<vmem>>, vector<1x16x1xf32>
    %54 = vector.shape_cast %53 : vector<1x16x1xf32> to vector<16x1xf32>
    %cst_38 = arith.constant dense<0xFF800000> : vector<16xf32>
    %55 = vector.multi_reduction <maximumf>, %52, %cst_38 [1] : vector<16x16xf32> to vector<16xf32>
    %56 = vector.shape_cast %55 : vector<16xf32> to vector<16x1xf32>
    %57 = arith.maximumf %54, %56 : vector<16x1xf32>
    %58 = arith.subf %54, %57 : vector<16x1xf32>
    %59 = math.exp %58 : vector<16x1xf32>
    %60 = vector.broadcast %57 : vector<16x1xf32> to vector<16x16xf32>
    %61 = arith.subf %52, %60 : vector<16x16xf32>
    %62 = math.exp %61 : vector<16x16xf32>
    %c1_39 = arith.constant 1 : index
    %c0_40 = arith.constant 0 : index
    %c0_41 = arith.constant 0 : index
    %63 = vector.load %arg20[%c1_39, %c0_40, %c0_41] : memref<4x16x1xf32, #tpu.memory_space<vmem>>, vector<1x16x1xf32>
    %64 = vector.shape_cast %63 : vector<1x16x1xf32> to vector<16x1xf32>
    %65 = arith.mulf %59, %64 : vector<16x1xf32>
    %cst_42 = arith.constant dense<0.000000e+00> : vector<16xf32>
    %66 = vector.multi_reduction <add>, %62, %cst_42 [1] : vector<16x16xf32> to vector<16xf32>
    %67 = vector.shape_cast %66 : vector<16xf32> to vector<16x1xf32>
    %68 = arith.addf %65, %67 : vector<16x1xf32>
    %c1_43 = arith.constant 1 : index
    %c0_44 = arith.constant 0 : index
    %c0_45 = arith.constant 0 : index
    %69 = vector.load %arg20[%c1_43, %c0_44, %c0_45] : memref<4x16x1xf32, #tpu.memory_space<vmem>>, vector<1x16x1xf32>
    %70 = vector.shape_cast %69 : vector<1x16x1xf32> to vector<16x1xf32>
    %71 = vector.shape_cast %68 : vector<16x1xf32> to vector<1x16x1xf32>
    tpu.vector_store %arg20[%c1_43, %c0_44, %c0_45], %71 {strides = array<i32>} : memref<4x16x1xf32, #tpu.memory_space<vmem>>, vector<1x16x1xf32>,
    %72 = arith.truncf %62 : vector<16x16xf32> to vector<16x16xbf16>
    %73 = vector.extract_strided_slice %12 {offsets = [0, 8], sizes = [16, 8], strides = [1, 1]} : vector<16x32xbf16> to vector<16x8xbf16>
    %cst_46 = arith.constant dense<0.000000e+00> : vector<16x8xf32>
    %74 = tpu.matmul %72, %73, %cst_46 {dimension_numbers = #tpu.dot_dimension_numbers<[1], [0], [0], [1], [0, 0, 1, 1], [], []>} : vector<16x16xbf16>, vector<16x8xbf16>, vector<16x8xf32> -> vector<16x8xf32>
    %c1_47 = arith.constant 1 : index
    %c0_48 = arith.constant 0 : index
    %c0_49 = arith.constant 0 : index
    %75 = vector.load %arg21[%c1_47, %c0_48, %c0_49] : memref<4x16x8xf32, #tpu.memory_space<vmem>>, vector<1x16x8xf32>
    %76 = vector.shape_cast %75 : vector<1x16x8xf32> to vector<16x8xf32>
    %77 = vector.broadcast %59 : vector<16x1xf32> to vector<16x8xf32>
    %78 = arith.mulf %77, %76 : vector<16x8xf32>
    %79 = arith.addf %78, %74 : vector<16x8xf32>
    %c1_50 = arith.constant 1 : index
    %c0_51 = arith.constant 0 : index
    %c0_52 = arith.constant 0 : index
    %80 = vector.load %arg21[%c1_50, %c0_51, %c0_52] : memref<4x16x8xf32, #tpu.memory_space<vmem>>, vector<1x16x8xf32>
    %81 = vector.shape_cast %80 : vector<1x16x8xf32> to vector<16x8xf32>
    %82 = vector.shape_cast %79 : vector<16x8xf32> to vector<1x16x8xf32>
    tpu.vector_store %arg21[%c1_50, %c0_51, %c0_52], %82 {strides = array<i32>} : memref<4x16x8xf32, #tpu.memory_space<vmem>>, vector<1x16x8xf32>,
    %c1_53 = arith.constant 1 : index
    %c0_54 = arith.constant 0 : index
    %c0_55 = arith.constant 0 : index
    %83 = vector.load %arg19[%c1_53, %c0_54, %c0_55] : memref<4x16x1xf32, #tpu.memory_space<vmem>>, vector<1x16x1xf32>
    %84 = vector.shape_cast %83 : vector<1x16x1xf32> to vector<16x1xf32>
    %85 = vector.shape_cast %57 : vector<16x1xf32> to vector<1x16x1xf32>
    tpu.vector_store %arg19[%c1_53, %c0_54, %c0_55], %85 {strides = array<i32>} : memref<4x16x1xf32, #tpu.memory_space<vmem>>, vector<1x16x1xf32>,
    %86 = vector.extract_strided_slice %13 {offsets = [0, 16], sizes = [16, 8], strides = [1, 1]} : vector<16x32xbf16> to vector<16x8xbf16>
    %87 = vector.extract_strided_slice %9 {offsets = [0, 16], sizes = [16, 8], strides = [1, 1]} : vector<16x32xbf16> to vector<16x8xbf16>
    %cst_56 = arith.constant dense<0.000000e+00> : vector<16x16xf32>
    %88 = tpu.matmul %86, %87, %cst_56 {dimension_numbers = #tpu.dot_dimension_numbers<[1], [1], [0], [0], [0, 0, 1, 0], [], []>} : vector<16x8xbf16>, vector<16x8xbf16>, vector<16x16xf32> -> vector<16x16xf32>
    %c2 = arith.constant 2 : index
    %c0_57 = arith.constant 0 : index
    %c0_58 = arith.constant 0 : index
    %89 = vector.load %arg19[%c2, %c0_57, %c0_58] : memref<4x16x1xf32, #tpu.memory_space<vmem>>, vector<1x16x1xf32>
    %90 = vector.shape_cast %89 : vector<1x16x1xf32> to vector<16x1xf32>
    %cst_59 = arith.constant dense<0xFF800000> : vector<16xf32>
    %91 = vector.multi_reduction <maximumf>, %88, %cst_59 [1] : vector<16x16xf32> to vector<16xf32>
    %92 = vector.shape_cast %91 : vector<16xf32> to vector<16x1xf32>
    %93 = arith.maximumf %90, %92 : vector<16x1xf32>
    %94 = arith.subf %90, %93 : vector<16x1xf32>
    %95 = math.exp %94 : vector<16x1xf32>
    %96 = vector.broadcast %93 : vector<16x1xf32> to vector<16x16xf32>
    %97 = arith.subf %88, %96 : vector<16x16xf32>
    %98 = math.exp %97 : vector<16x16xf32>
    %c2_60 = arith.constant 2 : index
    %c0_61 = arith.constant 0 : index
    %c0_62 = arith.constant 0 : index
    %99 = vector.load %arg20[%c2_60, %c0_61, %c0_62] : memref<4x16x1xf32, #tpu.memory_space<vmem>>, vector<1x16x1xf32>
    %100 = vector.shape_cast %99 : vector<1x16x1xf32> to vector<16x1xf32>
    %101 = arith.mulf %95, %100 : vector<16x1xf32>
    %cst_63 = arith.constant dense<0.000000e+00> : vector<16xf32>
    %102 = vector.multi_reduction <add>, %98, %cst_63 [1] : vector<16x16xf32> to vector<16xf32>
    %103 = vector.shape_cast %102 : vector<16xf32> to vector<16x1xf32>
    %104 = arith.addf %101, %103 : vector<16x1xf32>
    %c2_64 = arith.constant 2 : index
    %c0_65 = arith.constant 0 : index
    %c0_66 = arith.constant 0 : index
    %105 = vector.load %arg20[%c2_64, %c0_65, %c0_66] : memref<4x16x1xf32, #tpu.memory_space<vmem>>, vector<1x16x1xf32>
    %106 = vector.shape_cast %105 : vector<1x16x1xf32> to vector<16x1xf32>
    %107 = vector.shape_cast %104 : vector<16x1xf32> to vector<1x16x1xf32>
    tpu.vector_store %arg20[%c2_64, %c0_65, %c0_66], %107 {strides = array<i32>} : memref<4x16x1xf32, #tpu.memory_space<vmem>>, vector<1x16x1xf32>,
    %108 = arith.truncf %98 : vector<16x16xf32> to vector<16x16xbf16>
    %109 = vector.extract_strided_slice %12 {offsets = [0, 16], sizes = [16, 8], strides = [1, 1]} : vector<16x32xbf16> to vector<16x8xbf16>
    %cst_67 = arith.constant dense<0.000000e+00> : vector<16x8xf32>
    %110 = tpu.matmul %108, %109, %cst_67 {dimension_numbers = #tpu.dot_dimension_numbers<[1], [0], [0], [1], [0, 0, 1, 1], [], []>} : vector<16x16xbf16>, vector<16x8xbf16>, vector<16x8xf32> -> vector<16x8xf32>
    %c2_68 = arith.constant 2 : index
    %c0_69 = arith.constant 0 : index
    %c0_70 = arith.constant 0 : index
    %111 = vector.load %arg21[%c2_68, %c0_69, %c0_70] : memref<4x16x8xf32, #tpu.memory_space<vmem>>, vector<1x16x8xf32>
    %112 = vector.shape_cast %111 : vector<1x16x8xf32> to vector<16x8xf32>
    %113 = vector.broadcast %95 : vector<16x1xf32> to vector<16x8xf32>
    %114 = arith.mulf %113, %112 : vector<16x8xf32>
    %115 = arith.addf %114, %110 : vector<16x8xf32>
    %c2_71 = arith.constant 2 : index
    %c0_72 = arith.constant 0 : index
    %c0_73 = arith.constant 0 : index
    %116 = vector.load %arg21[%c2_71, %c0_72, %c0_73] : memref<4x16x8xf32, #tpu.memory_space<vmem>>, vector<1x16x8xf32>
    %117 = vector.shape_cast %116 : vector<1x16x8xf32> to vector<16x8xf32>
    %118 = vector.shape_cast %115 : vector<16x8xf32> to vector<1x16x8xf32>
    tpu.vector_store %arg21[%c2_71, %c0_72, %c0_73], %118 {strides = array<i32>} : memref<4x16x8xf32, #tpu.memory_space<vmem>>, vector<1x16x8xf32>,
    %c2_74 = arith.constant 2 : index
    %c0_75 = arith.constant 0 : index
    %c0_76 = arith.constant 0 : index
    %119 = vector.load %arg19[%c2_74, %c0_75, %c0_76] : memref<4x16x1xf32, #tpu.memory_space<vmem>>, vector<1x16x1xf32>
    %120 = vector.shape_cast %119 : vector<1x16x1xf32> to vector<16x1xf32>
    %121 = vector.shape_cast %93 : vector<16x1xf32> to vector<1x16x1xf32>
    tpu.vector_store %arg19[%c2_74, %c0_75, %c0_76], %121 {strides = array<i32>} : memref<4x16x1xf32, #tpu.memory_space<vmem>>, vector<1x16x1xf32>,
    %122 = vector.extract_strided_slice %13 {offsets = [0, 24], sizes = [16, 8], strides = [1, 1]} : vector<16x32xbf16> to vector<16x8xbf16>
    %123 = vector.extract_strided_slice %9 {offsets = [0, 24], sizes = [16, 8], strides = [1, 1]} : vector<16x32xbf16> to vector<16x8xbf16>
    %cst_77 = arith.constant dense<0.000000e+00> : vector<16x16xf32>
    %124 = tpu.matmul %122, %123, %cst_77 {dimension_numbers = #tpu.dot_dimension_numbers<[1], [1], [0], [0], [0, 0, 1, 0], [], []>} : vector<16x8xbf16>, vector<16x8xbf16>, vector<16x16xf32> -> vector<16x16xf32>
    %c3 = arith.constant 3 : index
    %c0_78 = arith.constant 0 : index
    %c0_79 = arith.constant 0 : index
    %125 = vector.load %arg19[%c3, %c0_78, %c0_79] : memref<4x16x1xf32, #tpu.memory_space<vmem>>, vector<1x16x1xf32>
    %126 = vector.shape_cast %125 : vector<1x16x1xf32> to vector<16x1xf32>
    %cst_80 = arith.constant dense<0xFF800000> : vector<16xf32>
    %127 = vector.multi_reduction <maximumf>, %124, %cst_80 [1] : vector<16x16xf32> to vector<16xf32>
    %128 = vector.shape_cast %127 : vector<16xf32> to vector<16x1xf32>
    %129 = arith.maximumf %126, %128 : vector<16x1xf32>
    %130 = arith.subf %126, %129 : vector<16x1xf32>
    %131 = math.exp %130 : vector<16x1xf32>
    %132 = vector.broadcast %129 : vector<16x1xf32> to vector<16x16xf32>
    %133 = arith.subf %124, %132 : vector<16x16xf32>
    %134 = math.exp %133 : vector<16x16xf32>
    %c3_81 = arith.constant 3 : index
    %c0_82 = arith.constant 0 : index
    %c0_83 = arith.constant 0 : index
    %135 = vector.load %arg20[%c3_81, %c0_82, %c0_83] : memref<4x16x1xf32, #tpu.memory_space<vmem>>, vector<1x16x1xf32>
    %136 = vector.shape_cast %135 : vector<1x16x1xf32> to vector<16x1xf32>
    %137 = arith.mulf %131, %136 : vector<16x1xf32>
    %cst_84 = arith.constant dense<0.000000e+00> : vector<16xf32>
    %138 = vector.multi_reduction <add>, %134, %cst_84 [1] : vector<16x16xf32> to vector<16xf32>
    %139 = vector.shape_cast %138 : vector<16xf32> to vector<16x1xf32>
    %140 = arith.addf %137, %139 : vector<16x1xf32>
    %c3_85 = arith.constant 3 : index
    %c0_86 = arith.constant 0 : index
    %c0_87 = arith.constant 0 : index
    %141 = vector.load %arg20[%c3_85, %c0_86, %c0_87] : memref<4x16x1xf32, #tpu.memory_space<vmem>>, vector<1x16x1xf32>
    %142 = vector.shape_cast %141 : vector<1x16x1xf32> to vector<16x1xf32>
    %143 = vector.shape_cast %140 : vector<16x1xf32> to vector<1x16x1xf32>
    tpu.vector_store %arg20[%c3_85, %c0_86, %c0_87], %143 {strides = array<i32>} : memref<4x16x1xf32, #tpu.memory_space<vmem>>, vector<1x16x1xf32>,
    %144 = arith.truncf %134 : vector<16x16xf32> to vector<16x16xbf16>
    %145 = vector.extract_strided_slice %12 {offsets = [0, 24], sizes = [16, 8], strides = [1, 1]} : vector<16x32xbf16> to vector<16x8xbf16>
    %cst_88 = arith.constant dense<0.000000e+00> : vector<16x8xf32>
    %146 = tpu.matmul %144, %145, %cst_88 {dimension_numbers = #tpu.dot_dimension_numbers<[1], [0], [0], [1], [0, 0, 1, 1], [], []>} : vector<16x16xbf16>, vector<16x8xbf16>, vector<16x8xf32> -> vector<16x8xf32>
    %c3_89 = arith.constant 3 : index
    %c0_90 = arith.constant 0 : index
    %c0_91 = arith.constant 0 : index
    %147 = vector.load %arg21[%c3_89, %c0_90, %c0_91] : memref<4x16x8xf32, #tpu.memory_space<vmem>>, vector<1x16x8xf32>
    %148 = vector.shape_cast %147 : vector<1x16x8xf32> to vector<16x8xf32>
    %149 = vector.broadcast %131 : vector<16x1xf32> to vector<16x8xf32>
    %150 = arith.mulf %149, %148 : vector<16x8xf32>
    %151 = arith.addf %150, %146 : vector<16x8xf32>
    %c3_92 = arith.constant 3 : index
    %c0_93 = arith.constant 0 : index
    %c0_94 = arith.constant 0 : index
    %152 = vector.load %arg21[%c3_92, %c0_93, %c0_94] : memref<4x16x8xf32, #tpu.memory_space<vmem>>, vector<1x16x8xf32>
    %153 = vector.shape_cast %152 : vector<1x16x8xf32> to vector<16x8xf32>
    %154 = vector.shape_cast %151 : vector<16x8xf32> to vector<1x16x8xf32>
    tpu.vector_store %arg21[%c3_92, %c0_93, %c0_94], %154 {strides = array<i32>} : memref<4x16x8xf32, #tpu.memory_space<vmem>>, vector<1x16x8xf32>,
    %c3_95 = arith.constant 3 : index
    %c0_96 = arith.constant 0 : index
    %c0_97 = arith.constant 0 : index
    %155 = vector.load %arg19[%c3_95, %c0_96, %c0_97] : memref<4x16x1xf32, #tpu.memory_space<vmem>>, vector<1x16x1xf32>
    %156 = vector.shape_cast %155 : vector<1x16x1xf32> to vector<16x1xf32>
    %157 = vector.shape_cast %129 : vector<16x1xf32> to vector<1x16x1xf32>
    tpu.vector_store %arg19[%c3_95, %c0_96, %c0_97], %157 {strides = array<i32>} : memref<4x16x1xf32, #tpu.memory_space<vmem>>, vector<1x16x1xf32>,
    %c0_i32_98 = arith.constant 0 : i32
    %158 = arith.cmpi eq, %arg2, %c0_i32_98 : i32
    %159 = arith.extui %158 : i1 to i32
    %c0_i32_99 = arith.constant 0 : i32
    %160 = arith.cmpi ne, %159, %c0_i32_99 : i32
    scf.if %160 {
      %c0_100 = arith.constant 0 : index
      %c0_101 = arith.constant 0 : index
      %c0_102 = arith.constant 0 : index
      %161 = vector.load %arg3[%c0_100, %c0_101, %c0_102] : memref<1x16x32xf32, #tpu.memory_space<vmem>>, vector<1x16x32xf32>
      %162 = vector.shape_cast %161 : vector<1x16x32xf32> to vector<16x32xf32>
      %c0_103 = arith.constant 0 : index
      %c0_104 = arith.constant 0 : index
      %c0_105 = arith.constant 0 : index
      %163 = vector.load %arg21[%c0_103, %c0_104, %c0_105] : memref<4x16x8xf32, #tpu.memory_space<vmem>>, vector<1x16x8xf32>
      %164 = vector.shape_cast %163 : vector<1x16x8xf32> to vector<16x8xf32>
      %c0_106 = arith.constant 0 : index
      %c0_107 = arith.constant 0 : index
      %c0_108 = arith.constant 0 : index
      %165 = vector.load %arg20[%c0_106, %c0_107, %c0_108] : memref<4x16x1xf32, #tpu.memory_space<vmem>>, vector<1x16x1xf32>
      %166 = vector.shape_cast %165 : vector<1x16x1xf32> to vector<16x1xf32>
      %167 = tpu.reciprocal %166 {approx = true} : vector<16x1xf32> -> vector<16x1xf32>
      %168 = vector.broadcast %167 : vector<16x1xf32> to vector<16x8xf32>
      %169 = arith.mulf %164, %168 : vector<16x8xf32>
      %c1_109 = arith.constant 1 : index
      %c0_110 = arith.constant 0 : index
      %c0_111 = arith.constant 0 : index
      %170 = vector.load %arg21[%c1_109, %c0_110, %c0_111] : memref<4x16x8xf32, #tpu.memory_space<vmem>>, vector<1x16x8xf32>
      %171 = vector.shape_cast %170 : vector<1x16x8xf32> to vector<16x8xf32>
      %c1_112 = arith.constant 1 : index
      %c0_113 = arith.constant 0 : index
      %c0_114 = arith.constant 0 : index
      %172 = vector.load %arg20[%c1_112, %c0_113, %c0_114] : memref<4x16x1xf32, #tpu.memory_space<vmem>>, vector<1x16x1xf32>
      %173 = vector.shape_cast %172 : vector<1x16x1xf32> to vector<16x1xf32>
      %174 = tpu.reciprocal %173 {approx = true} : vector<16x1xf32> -> vector<16x1xf32>
      %175 = vector.broadcast %174 : vector<16x1xf32> to vector<16x8xf32>
      %176 = arith.mulf %171, %175 : vector<16x8xf32>
      %c2_115 = arith.constant 2 : index
      %c0_116 = arith.constant 0 : index
      %c0_117 = arith.constant 0 : index
      %177 = vector.load %arg21[%c2_115, %c0_116, %c0_117] : memref<4x16x8xf32, #tpu.memory_space<vmem>>, vector<1x16x8xf32>
      %178 = vector.shape_cast %177 : vector<1x16x8xf32> to vector<16x8xf32>
      %c2_118 = arith.constant 2 : index
      %c0_119 = arith.constant 0 : index
      %c0_120 = arith.constant 0 : index
      %179 = vector.load %arg20[%c2_118, %c0_119, %c0_120] : memref<4x16x1xf32, #tpu.memory_space<vmem>>, vector<1x16x1xf32>
      %180 = vector.shape_cast %179 : vector<1x16x1xf32> to vector<16x1xf32>
      %181 = tpu.reciprocal %180 {approx = true} : vector<16x1xf32> -> vector<16x1xf32>
      %182 = vector.broadcast %181 : vector<16x1xf32> to vector<16x8xf32>
      %183 = arith.mulf %178, %182 : vector<16x8xf32>
      %c3_121 = arith.constant 3 : index
      %c0_122 = arith.constant 0 : index
      %c0_123 = arith.constant 0 : index
      %184 = vector.load %arg21[%c3_121, %c0_122, %c0_123] : memref<4x16x8xf32, #tpu.memory_space<vmem>>, vector<1x16x8xf32>
      %185 = vector.shape_cast %184 : vector<1x16x8xf32> to vector<16x8xf32>
      %c3_124 = arith.constant 3 : index
      %c0_125 = arith.constant 0 : index
      %c0_126 = arith.constant 0 : index
      %186 = vector.load %arg20[%c3_124, %c0_125, %c0_126] : memref<4x16x1xf32, #tpu.memory_space<vmem>>, vector<1x16x1xf32>
      %187 = vector.shape_cast %186 : vector<1x16x1xf32> to vector<16x1xf32>
      %188 = tpu.reciprocal %187 {approx = true} : vector<16x1xf32> -> vector<16x1xf32>
      %189 = vector.broadcast %188 : vector<16x1xf32> to vector<16x8xf32>
      %190 = arith.mulf %185, %189 : vector<16x8xf32>
      %191 = tpu.concatenate %169, %176, %183, %190 in 1 : vector<16x8xf32>, vector<16x8xf32>, vector<16x8xf32>, vector<16x8xf32> -> vector<16x32xf32>
      %c0_127 = arith.constant 0 : index
      %c0_128 = arith.constant 0 : index
      %192 = vector.load %arg9[%c0_127, %c0_128] : memref<32x32xf32, #tpu.memory_space<vmem>>, vector<32x32xf32>
      %cst_129 = arith.constant dense<0.000000e+00> : vector<16x32xf32>
      %193 = tpu.matmul %191, %192, %cst_129 {dimension_numbers = #tpu.dot_dimension_numbers<[1], [0], [0], [1], [0, 0, 1, 1], [], []>} : vector<16x32xf32>, vector<32x32xf32>, vector<16x32xf32> -> vector<16x32xf32>
      %c0_130 = arith.constant 0 : index
      %c0_131 = arith.constant 0 : index
      %194 = vector.load %arg10[%c0_130, %c0_131] : memref<1x32xf32, #tpu.memory_space<vmem>>, vector<1x32xf32>
      %c0_132 = arith.constant 0 : index
      %c0_133 = arith.constant 0 : index
      %195 = vector.load %arg11[%c0_132, %c0_133] : memref<1x32xf32, #tpu.memory_space<vmem>>, vector<1x32xf32>
      %cst_134 = arith.constant dense<0.000000e+00> : vector<16xf32>
      %196 = vector.multi_reduction <add>, %193, %cst_134 [1] : vector<16x32xf32> to vector<16xf32>
      %197 = vector.shape_cast %196 : vector<16xf32> to vector<16x1xf32>
      %cst_135 = arith.constant 3.200000e+01 : f32
      %198 = vector.broadcast %cst_135 : f32 to vector<16x1xf32>
      %199 = arith.divf %197, %198 : vector<16x1xf32>
      %200 = arith.mulf %193, %193 : vector<16x32xf32>
      %cst_136 = arith.constant dense<0.000000e+00> : vector<16xf32>
      %201 = vector.multi_reduction <add>, %200, %cst_136 [1] : vector<16x32xf32> to vector<16xf32>
      %202 = vector.shape_cast %201 : vector<16xf32> to vector<16x1xf32>
      %cst_137 = arith.constant 3.200000e+01 : f32
      %203 = vector.broadcast %cst_137 : f32 to vector<16x1xf32>
      %204 = arith.divf %202, %203 : vector<16x1xf32>
      %205 = arith.mulf %199, %199 : vector<16x1xf32>
      %206 = arith.subf %204, %205 : vector<16x1xf32>
      %207 = vector.broadcast %199 : vector<16x1xf32> to vector<16x32xf32>
      %208 = arith.subf %193, %207 : vector<16x32xf32>
      %cst_138 = arith.constant 9.99999974E-6 : f32
      %209 = vector.broadcast %cst_138 : f32 to vector<16x1xf32>
      %210 = arith.addf %206, %209 : vector<16x1xf32>
      %211 = math.rsqrt %210 : vector<16x1xf32>
      %212 = vector.broadcast %211 : vector<16x1xf32> to vector<16x32xf32>
      %213 = arith.mulf %208, %212 : vector<16x32xf32>
      %214 = vector.broadcast %194 : vector<1x32xf32> to vector<16x32xf32>
      %215 = arith.mulf %213, %214 : vector<16x32xf32>
      %216 = vector.broadcast %195 : vector<1x32xf32> to vector<16x32xf32>
      %217 = arith.addf %215, %216 : vector<16x32xf32>
      %c0_139 = arith.constant 0 : index
      %c0_140 = arith.constant 0 : index
      %218 = vector.load %arg12[%c0_139, %c0_140] : memref<32x64xf32, #tpu.memory_space<vmem>>, vector<32x64xf32>
      %cst_141 = arith.constant dense<0.000000e+00> : vector<16x64xf32>
      %219 = tpu.matmul %162, %218, %cst_141 {dimension_numbers = #tpu.dot_dimension_numbers<[1], [0], [0], [1], [0, 0, 1, 1], [], []>} : vector<16x32xf32>, vector<32x64xf32>, vector<16x64xf32> -> vector<16x64xf32>
      %c0_142 = arith.constant 0 : index
      %c0_143 = arith.constant 0 : index
      %220 = vector.load %arg13[%c0_142, %c0_143] : memref<32x64xf32, #tpu.memory_space<vmem>>, vector<32x64xf32>
      %cst_144 = arith.constant dense<0.000000e+00> : vector<16x64xf32>
      %221 = tpu.matmul %217, %220, %cst_144 {dimension_numbers = #tpu.dot_dimension_numbers<[1], [0], [0], [1], [0, 0, 1, 1], [], []>} : vector<16x32xf32>, vector<32x64xf32>, vector<16x64xf32> -> vector<16x64xf32>
      %222 = arith.addf %219, %221 : vector<16x64xf32>
      %cst_145 = arith.constant 0.000000e+00 : f32
      %223 = vector.broadcast %cst_145 : f32 to vector<16x64xf32>
      %224 = arith.maximumf %222, %223 : vector<16x64xf32>
      %c0_146 = arith.constant 0 : index
      %c0_147 = arith.constant 0 : index
      %225 = vector.load %arg14[%c0_146, %c0_147] : memref<64x32xf32, #tpu.memory_space<vmem>>, vector<64x32xf32>
      %cst_148 = arith.constant dense<0.000000e+00> : vector<16x32xf32>
      %226 = tpu.matmul %224, %225, %cst_148 {dimension_numbers = #tpu.dot_dimension_numbers<[1], [0], [0], [1], [0, 0, 1, 1], [], []>} : vector<16x64xf32>, vector<64x32xf32>, vector<16x32xf32> -> vector<16x32xf32>
      %c0_149 = arith.constant 0 : index
      %c0_150 = arith.constant 0 : index
      %227 = vector.load %arg15[%c0_149, %c0_150] : memref<1x32xf32, #tpu.memory_space<vmem>>, vector<1x32xf32>
      %c0_151 = arith.constant 0 : index
      %c0_152 = arith.constant 0 : index
      %228 = vector.load %arg16[%c0_151, %c0_152] : memref<1x32xf32, #tpu.memory_space<vmem>>, vector<1x32xf32>
      %cst_153 = arith.constant dense<0.000000e+00> : vector<16xf32>
      %229 = vector.multi_reduction <add>, %226, %cst_153 [1] : vector<16x32xf32> to vector<16xf32>
      %230 = vector.shape_cast %229 : vector<16xf32> to vector<16x1xf32>
      %cst_154 = arith.constant 3.200000e+01 : f32
      %231 = vector.broadcast %cst_154 : f32 to vector<16x1xf32>
      %232 = arith.divf %230, %231 : vector<16x1xf32>
      %233 = arith.mulf %226, %226 : vector<16x32xf32>
      %cst_155 = arith.constant dense<0.000000e+00> : vector<16xf32>
      %234 = vector.multi_reduction <add>, %233, %cst_155 [1] : vector<16x32xf32> to vector<16xf32>
      %235 = vector.shape_cast %234 : vector<16xf32> to vector<16x1xf32>
      %cst_156 = arith.constant 3.200000e+01 : f32
      %236 = vector.broadcast %cst_156 : f32 to vector<16x1xf32>
      %237 = arith.divf %235, %236 : vector<16x1xf32>
      %238 = arith.mulf %232, %232 : vector<16x1xf32>
      %239 = arith.subf %237, %238 : vector<16x1xf32>
      %240 = vector.broadcast %232 : vector<16x1xf32> to vector<16x32xf32>
      %241 = arith.subf %226, %240 : vector<16x32xf32>
      %cst_157 = arith.constant 9.99999974E-6 : f32
      %242 = vector.broadcast %cst_157 : f32 to vector<16x1xf32>
      %243 = arith.addf %239, %242 : vector<16x1xf32>
      %244 = math.rsqrt %243 : vector<16x1xf32>
      %245 = vector.broadcast %244 : vector<16x1xf32> to vector<16x32xf32>
      %246 = arith.mulf %241, %245 : vector<16x32xf32>
      %247 = vector.broadcast %227 : vector<1x32xf32> to vector<16x32xf32>
      %248 = arith.mulf %246, %247 : vector<16x32xf32>
      %249 = vector.broadcast %228 : vector<1x32xf32> to vector<16x32xf32>
      %250 = arith.addf %248, %249 : vector<16x32xf32>
      %251 = arith.addf %162, %250 : vector<16x32xf32>
      %c0_158 = arith.constant 0 : index
      %c0_159 = arith.constant 0 : index
      %c0_160 = arith.constant 0 : index
      %252 = vector.load %arg17[%c0_158, %c0_159, %c0_160] : memref<1x16x32xf32, #tpu.memory_space<vmem>>, vector<1x16x32xf32>
      %253 = vector.shape_cast %252 : vector<1x16x32xf32> to vector<16x32xf32>
      %254 = vector.shape_cast %251 : vector<16x32xf32> to vector<1x16x32xf32>
      tpu.vector_store %arg17[%c0_158, %c0_159, %c0_160], %254 {strides = array<i32>} : memref<1x16x32xf32, #tpu.memory_space<vmem>>, vector<1x16x32xf32>,
    } else {
    }
    return
  }
  func.func @transform_0(%arg0: i32, %arg1: i32, %arg2: i32) -> (i32, i32, i32) {
    %c0_i32 = arith.constant 0 : i32
    %c0_i32_0 = arith.constant 0 : i32
    return %arg0, %arg1, %c0_i32 : i32, i32, i32
  }
  func.func @transform_1(%arg0: i32, %arg1: i32, %arg2: i32) -> (i32, i32, i32) {
    %c0_i32 = arith.constant 0 : i32
    %c0_i32_0 = arith.constant 0 : i32
    return %arg0, %arg2, %c0_i32 : i32, i32, i32
  }
  func.func @transform_2(%arg0: i32, %arg1: i32, %arg2: i32) -> (i32, i32, i32) {
    %c0_i32 = arith.constant 0 : i32
    %c0_i32_0 = arith.constant 0 : i32
    return %arg0, %arg2, %c0_i32 : i32, i32, i32
  }
  func.func @transform_3(%arg0: i32, %arg1: i32, %arg2: i32) -> (i32, i32) {
    %c0_i32 = arith.constant 0 : i32
    %c0_i32_0 = arith.constant 0 : i32
    %c0_i32_1 = arith.constant 0 : i32
    return %c0_i32, %c0_i32_0 : i32, i32
  }
  func.func @transform_4(%arg0: i32, %arg1: i32, %arg2: i32) -> (i32, i32) {
    %c0_i32 = arith.constant 0 : i32
    %c0_i32_0 = arith.constant 0 : i32
    %c0_i32_1 = arith.constant 0 : i32
    return %c0_i32, %c0_i32_0 : i32, i32
  }
  func.func @transform_5(%arg0: i32, %arg1: i32, %arg2: i32) -> (i32, i32) {
    %c0_i32 = arith.constant 0 : i32
    %c0_i32_0 = arith.constant 0 : i32
    %c0_i32_1 = arith.constant 0 : i32
    return %c0_i32, %c0_i32_0 : i32, i32
  }
  func.func @transform_6(%arg0: i32, %arg1: i32, %arg2: i32) -> (i32, i32) {
    %c0_i32 = arith.constant 0 : i32
    %c0_i32_0 = arith.constant 0 : i32
    %c0_i32_1 = arith.constant 0 : i32
    return %c0_i32, %c0_i32_0 : i32, i32
  }
  func.func @transform_7(%arg0: i32, %arg1: i32, %arg2: i32) -> (i32, i32) {
    %c0_i32 = arith.constant 0 : i32
    %c0_i32_0 = arith.constant 0 : i32
    %c0_i32_1 = arith.constant 0 : i32
    return %c0_i32, %c0_i32_0 : i32, i32
  }
  func.func @transform_8(%arg0: i32, %arg1: i32, %arg2: i32) -> (i32, i32) {
    %c0_i32 = arith.constant 0 : i32
    %c0_i32_0 = arith.constant 0 : i32
    %c0_i32_1 = arith.constant 0 : i32
    return %c0_i32, %c0_i32_0 : i32, i32
  }
  func.func @transform_9(%arg0: i32, %arg1: i32, %arg2: i32) -> (i32, i32) {
    %c0_i32 = arith.constant 0 : i32
    %c0_i32_0 = arith.constant 0 : i32
    %c0_i32_1 = arith.constant 0 : i32
    return %c0_i32, %c0_i32_0 : i32, i32
  }
  func.func @transform_10(%arg0: i32, %arg1: i32, %arg2: i32) -> (i32, i32) {
    %c0_i32 = arith.constant 0 : i32
    %c0_i32_0 = arith.constant 0 : i32
    %c0_i32_1 = arith.constant 0 : i32
    return %c0_i32, %c0_i32_0 : i32, i32
  }
  func.func @transform_11(%arg0: i32, %arg1: i32, %arg2: i32) -> (i32, i32) {
    %c0_i32 = arith.constant 0 : i32
    %c0_i32_0 = arith.constant 0 : i32
    %c0_i32_1 = arith.constant 0 : i32
    return %c0_i32, %c0_i32_0 : i32, i32
  }
  func.func @transform_12(%arg0: i32, %arg1: i32, %arg2: i32) -> (i32, i32) {
    %c0_i32 = arith.constant 0 : i32
    %c0_i32_0 = arith.constant 0 : i32
    %c0_i32_1 = arith.constant 0 : i32
    return %c0_i32, %c0_i32_0 : i32, i32
  }
  func.func @transform_13(%arg0: i32, %arg1: i32, %arg2: i32) -> (i32, i32) {
    %c0_i32 = arith.constant 0 : i32
    %c0_i32_0 = arith.constant 0 : i32
    %c0_i32_1 = arith.constant 0 : i32
    return %c0_i32, %c0_i32_0 : i32, i32
  }
  func.func @transform_14(%arg0: i32, %arg1: i32, %arg2: i32) -> (i32, i32, i32) {
    %c0_i32 = arith.constant 0 : i32
    %c0_i32_0 = arith.constant 0 : i32
    return %arg0, %arg1, %c0_i32 : i32, i32, i32
  }
}

</mosaic_0001>

<bundles_post_ra>
// kernel: tpu_custom_call.1
= control target key start
LH: loop header
LB: loop body
LE: loop exit
PB: predicated region body
PF: predicated region fallthrough
CT: control target
= control target key end

     0   :  { %s3891_s0 = inlined_call_operand.vmem [shape: f32[2,16,32], index: 0, kind: input, shape index: {}]   ;;  %s3892_s1 = inlined_call_operand.vmem [shape: f32[2,16,32], index: 1, kind: input, shape index: {}]   ;;  %s3893_s2 = inlined_call_operand.vmem [shape: f32[2,16,32], index: 2, kind: input, shape index: {}]   ;;  %s3894_s3 = inlined_call_operand.hbm [shape: f32[32,32], index: 3, kind: input, shape index: {}]   ;;  %s3895_s4 = inlined_call_operand.hbm [shape: f32[32,32], index: 4, kind: input, shape index: {}]   ;;  %s3896_s5 = inlined_call_operand.hbm [shape: f32[32,32], index: 5, kind: input, shape index: {}]   ;;  %s3897_s6 = inlined_call_operand.hbm [shape: f32[32,32], index: 6, kind: input, shape index: {}]   ;;  %s3898_s7 = inlined_call_operand.vmem [shape: f32[1,32], index: 7, kind: input, shape index: {}]   ;;  %s3899_s8 = inlined_call_operand.vmem [shape: f32[1,32], index: 8, kind: input, shape index: {}]   ;;  %s3900_s9 = inlined_call_operand.hbm [shape: f32[32,64], index: 9, kind: input, shape index: {}]   ;;  %s3901_s10 = inlined_call_operand.hbm [shape: f32[32,64], index: 10, kind: input, shape index: {}]   ;;  %s3902_s11 = inlined_call_operand.vmem [shape: f32[64,32], index: 11, kind: input, shape index: {}]   ;;  %s3903_s12 = inlined_call_operand.vmem [shape: f32[1,32], index: 12, kind: input, shape index: {}]   ;;  %s3904_s13 = inlined_call_operand.vmem [shape: f32[1,32], index: 13, kind: input, shape index: {}]   ;;  %s3905_s14 = inlined_call_operand.hbm [shape: f32[2,16,32], index: 14, kind: output, shape index: {}]  }
   0x1   :  { %3921 = sst [smem:[#allocation32_spill]] %s3895_s4 }
   0x2   :  { %3922 = sst [smem:[#allocation33_spill]] %s3903_s12 }
   0x3   :  { %3923 = sst [smem:[#allocation34_spill]] %s3904_s13 }
   0x4   :  { %3924 = sst [smem:[#allocation35_spill]] %s3905_s14 }
   0x5   :  { %19 = vsyncpa [#allocation7], 0 }
   0x6   :  { %20 = vsyncpa [#allocation10], 0 }
   0x7   :  { %21 = vsyncpa [#allocation13], 0 }
   0x8   :  { %22 = vsyncpa [#allocation16], 0 }
   0x9   :  { %23 = vsyncpa [#allocation8], 0 }
   0xa   :  { %25 = vsyncpa [#allocation8 + $0x1], 0  ;;  %s3247_s29 = smov 0   ;;  %s3249_s30 = smov 0  }
   0xb   :  { %s3251_s15 = smov 0   ;;  %s3253_s16 = smov 0  }
   0xc   :  { %s3255_s17 = smov 0   ;;  %s3257_s18 = smov 0  }
   0xd LB: > { %3925 = sst [smem:[#allocation23_spill]] %s3130_s29  ;;  %s2381_s19 = sadd.s32 4294967295, %s3150_s18   ;;  %s3150_s18 = sphi %s3257_s18, %s31_s18   ;;  %s3146_s17 = sphi %s3255_s17, %s3958_s17   ;;  %s3142_s16 = sphi %s3253_s16, %s3957_s16   ;;  %s3138_s15 = sphi %s3251_s15, %s3956_s15   ;;  %s3134_s30 = sphi %s3249_s30, %s3955_s30   ;;  %s3130_s29 = sphi %s3247_s29, %s3954_s29  }
   0xe   : > { %3926 = sst [smem:[#allocation24_spill]] %s3134_s30  ;;  %s2382_s20 = sadd.s32 4294967294, %s3150_s18  }
   0xf   : > { %3927 = sst [smem:[#allocation25_spill]] %s3138_s15  ;;  %s50_s21 = sadd.s32 1, %s3146_s17 }
  0x10   : > { %3928 = sst [smem:[#allocation26_spill]] %s3146_s17  ;;  %s374_s22 = sadd.s32 1, %s3138_s15 }
  0x11   : > { %3929 = sst [smem:[#allocation27_spill]] %s3150_s18  ;;  %p52_p0 = scmp.ge.s32.totalorder %s50_s21, 2 }
  0x12   : > { %p384_p1 = scmp.ne.s32.totalorder %s3138_s15, %s3134_s30  ;;  %p385_p2 = scmp.eq.s32.totalorder %s2381_s19, 1 }
  0x13   : > { %p390_p3 = scmp.ne.s32.totalorder %s3134_s30, %s3130_s29  ;;  %s3960_s21 = smov (%p52_p0, %s50_s21), 0 }
  0x14   : > { %3930 = sst [smem:[#allocation28_spill]] %s3960_s21  ;;  %p3287_p4 = por %p385_p2, %p384_p1 }
  0x15   : > { %p391_p5 = scmp.eq.s32.totalorder %s2382_s20, 1  ;;  %s369_s24 = ssub.s32 %s3146_s17, %s3960_s21 }
  0x16   : > { %s3931_s23 = scalar_select %p3287_p4, 1, 0 }
  0x17   : > { %p2383_p6 = scmp.ge.s32.totalorder %s3150_s18, 1  ;;  %p372_p7 = scmp.eq.s32.totalorder %s369_s24, 0 }
  0x18   : > { %3932 = sst [smem:[#allocation29_spill]] %s3931_s23  ;;  %p3294_p8 = por %p391_p5, %p390_p3 }
  0x19   : > { %p398_p9 = scmp.lt.s32.totalorder %s3150_s18, 3  ;;  %p3306_p11 = scmp.eq.s32.totalorder %s2381_s19, 0 }
  0x1a   : > { %s3933_s25 = scalar_select %p3294_p8, 1, 0 }
  0x1b   : > { %s3300_s26 = scalar_select %p372_p7, %s3138_s15, %s374_s22  }
  0x1c   : > { %3934 = sst [smem:[#allocation30_spill]] %s3933_s25  ;;  %p3302_p10 = pnand %p2383_p6, %p398_p9 }
  0x1d   : > { %3935 = sst [smem:[#allocation31_spill]] %s3300_s26  ;;  %s3152_s20 = smov [#allocation9]  }
  0x1e   : > { %s3936_s27 = scalar_select %p3302_p10, 1, 0 }
  0x1f   : > { %s3937_s28 = scalar_select %p3306_p11, 1, 0 }
  0x20   : > { %p2727_p12 = pneg %p3302_p10  ;;  %s423_s24 = sshll.u32 %s3152_s20, 4  ;;  %s424_s24 = int_to_ptr.vmem [resolvable:$true] %s423_s24 }
  0x21   : > { %s3153_s22 = smov [#allocation12]   ;;  %s3939_s4 = sld [smem:[#allocation32_spill]] }
  0x22   : > { %p3314_p13 = pnand %p3306_p11, %p2727_p12  ;;  %s449_s17 = sshll.u32 %s3153_s22, 4  ;;  %s3318_s17 = int_to_ptr.vmem [resolvable:$true] %s449_s17 }
  0x24   : > { %p3328_p1 = pneg %p3314_p13 }
  0x27   : > { %s2888_s15 = scalar_lea.hbm %s3939_s4, 512 }
  0x28   : > { %p2889_p0 = scmp.ne.s32.totalorder %s3939_s4, %s2888_s15  ;;  %p2895_p5 = scmp.lt.u32.totalorder %s2888_s15, %s3939_s4 }
  0x2a   : > { %p2891_p2 = pnand %p3328_p1, %p2889_p0 }
  0x2c   : > { %p2892_p3 = pneg %p2891_p2 }
  0x2e   : > { %p2897_p6 = pnand %p2895_p5, %p2892_p3 }
  0x30   : > { %2900 = shalt.err (!%p2897_p6)
}
  0x31   : > { %s2901_s26 = scalar_lea.vmem %s424_s24, 512  ;;  %p2909_p8 = scmp.lt.s32.totalorder %s424_s24, %s424_s24 }
  0x32   : > { %p2902_p7 = scmp.ne.s32.totalorder %s424_s24, %s2901_s26  ;;  %p2910_p4 = scmp.lt.s32.totalorder %s2901_s26, %s2901_s26 }
  0x34   : > { %p2904_p9 = pnand %p2902_p7, %p3328_p1  ;;  %p2911_p11 = por %p2910_p4, %p2909_p8 }
  0x36   : > { %p2905_p12 = pneg %p2904_p9 }
  0x38   : > { %p2912_p10 = pnand %p2911_p11, %p2905_p12 }
  0x3a   : > { %2915 = shalt.err (!%p2912_p10)
}
  0x3b   : > { %s3154_s29 = smov 128   ;;  %s3155_s25 = smov 8  }
  0x3c   : > { %2733 = dma.hbm_to_vmem [thread:$0]  (!%p3314_p13), %s3939_s4, 512, %s424_s24, [#allocation10], %s3154_s29, %s3154_s29, %s3155_s25  }
  0x3d   : > { %s2916_s14 = scalar_lea.hbm %s3897_s6, 512 }
  0x3e   : > { %p2917_p4 = scmp.ne.s32.totalorder %s3897_s6, %s2916_s14  ;;  %p2923_p11 = scmp.lt.u32.totalorder %s2916_s14, %s3897_s6 }
  0x40   : > { %p2919_p8 = pnand %p2917_p4, %p3328_p1 }
  0x42   : > { %p2920_p10 = pneg %p2919_p8 }
  0x44   : > { %p2925_p0 = pnand %p2923_p11, %p2920_p10 }
  0x46   : > { %2928 = shalt.err (!%p2925_p0)
}
  0x47   : > { %s2929_s24 = scalar_lea.vmem %s3318_s17, 512  ;;  %p2937_p6 = scmp.lt.s32.totalorder %s3318_s17, %s3318_s17 }
  0x48   : > { %p2930_p2 = scmp.ne.s32.totalorder %s3318_s17, %s2929_s24  ;;  %p2938_p7 = scmp.lt.s32.totalorder %s2929_s24, %s2929_s24 }
  0x4a   : > { %p2932_p3 = pnand %p2930_p2, %p3328_p1  ;;  %p2939_p9 = por %p2938_p7, %p2937_p6 }
  0x4c   : > { %p2933_p5 = pneg %p2932_p3 }
  0x4e   : > { %p2940_p12 = pnand %p2939_p9, %p2933_p5 }
  0x50   : > { %2943 = shalt.err (!%p2940_p12)
}
  0x51   : > { %2739 = dma.hbm_to_vmem [thread:$0]  (!%p3314_p13), %s3897_s6, 512, %s3318_s17, [#allocation13], %s3154_s29, %s3154_s29, %s3155_s25  }
  0x52   : > { %s3156_s14 = smov [#allocation6]   ;;  %s3157_s15 = smov [#allocation11]  }
  0x53   : > { %s410_s23 = sshll.u32 %s3156_s14, 4  ;;  %s436_s18 = sshll.u32 %s3157_s15, 4  ;;  %s411_s23 = int_to_ptr.vmem [resolvable:$true] %s410_s23  ;;  %s437_s18 = int_to_ptr.vmem [resolvable:$true] %s436_s18 }
  0x54   : > { %s2944_s26 = scalar_lea.hbm %s3894_s3, 512 }
  0x55   : > { %p2945_p4 = scmp.ne.s32.totalorder %s3894_s3, %s2944_s26  ;;  %p2951_p11 = scmp.lt.u32.totalorder %s2944_s26, %s3894_s3 }
  0x57   : > { %p2947_p8 = pnand %p2945_p4, %p3328_p1 }
  0x59   : > { %p2948_p10 = pneg %p2947_p8 }
  0x5b   : > { %p2953_p0 = pnand %p2951_p11, %p2948_p10 }
  0x5d   : > { %2956 = shalt.err (!%p2953_p0)
}
  0x5e   : > { %s2957_s17 = scalar_lea.vmem %s411_s23, 512  ;;  %p2965_p6 = scmp.lt.s32.totalorder %s411_s23, %s411_s23 }
  0x5f   : > { %p2958_p2 = scmp.ne.s32.totalorder %s411_s23, %s2957_s17  ;;  %p2966_p7 = scmp.lt.s32.totalorder %s2957_s17, %s2957_s17 }
  0x61   : > { %p2960_p3 = pnand %p2958_p2, %p3328_p1  ;;  %p2967_p9 = por %p2966_p7, %p2965_p6 }
  0x63   : > { %p2961_p5 = pneg %p2960_p3 }
  0x65   : > { %p2968_p12 = pnand %p2967_p9, %p2961_p5 }
  0x67   : > { %2971 = shalt.err (!%p2968_p12)
}
  0x68   : > { %2730 = dma.hbm_to_vmem [thread:$0]  (!%p3314_p13), %s3894_s3, 512, %s411_s23, [#allocation7], %s3154_s29, %s3154_s29, %s3155_s25  }
  0x69   : > { %s2972_s15 = scalar_lea.hbm %s3896_s5, 512 }
  0x6a   : > { %p2973_p4 = scmp.ne.s32.totalorder %s3896_s5, %s2972_s15  ;;  %p2979_p11 = scmp.lt.u32.totalorder %s2972_s15, %s3896_s5 }
  0x6c   : > { %p2975_p8 = pnand %p2973_p4, %p3328_p1 }
  0x6e   : > { %p2976_p10 = pneg %p2975_p8 }
  0x70   : > { %p2981_p0 = pnand %p2979_p11, %p2976_p10 }
  0x72   : > { %2984 = shalt.err (!%p2981_p0)
}
  0x73   : > { %s2985_s12 = scalar_lea.vmem %s437_s18, 512  ;;  %p2993_p6 = scmp.lt.s32.totalorder %s437_s18, %s437_s18 }
  0x74   : > { %p2986_p2 = scmp.ne.s32.totalorder %s437_s18, %s2985_s12  ;;  %p2994_p7 = scmp.lt.s32.totalorder %s2985_s12, %s2985_s12 }
  0x76   : > { %p2988_p3 = pnand %p2986_p2, %p3328_p1  ;;  %p2995_p9 = por %p2994_p7, %p2993_p6 }
  0x78   : > { %p2989_p5 = pneg %p2988_p3 }
  0x7a   : > { %p2996_p12 = pnand %p2995_p9, %p2989_p5 }
  0x7c   : > { %2999 = shalt.err (!%p2996_p12)
}
  0x7d   : > { %2736 = dma.hbm_to_vmem [thread:$0]  (!%p3314_p13), %s3896_s5, 512, %s437_s18, [#allocation10], %s3154_s29, %s3154_s29, %s3155_s25  }
  0x7e   : > { %s3158_s4 = smov [#allocation14]   ;;  %s3159_s13 = smov [#allocation15]  }
  0x7f   : > { %s468_s30 = sshll.u32 %s3158_s4, 4  ;;  %s481_s14 = sshll.u32 %s3159_s13, 4  ;;  %s469_s30 = int_to_ptr.vmem [resolvable:$true] %s468_s30  ;;  %s482_s14 = int_to_ptr.vmem [resolvable:$true] %s481_s14 }
  0x80   : > { %s3000_s22 = scalar_lea.hbm %s3900_s9, 512 }
  0x81   : > { %p3001_p4 = scmp.ne.s32.totalorder %s3900_s9, %s3000_s22  ;;  %p3007_p11 = scmp.lt.u32.totalorder %s3000_s22, %s3900_s9 }
  0x83   : > { %p3003_p8 = pnand %p3001_p4, %p3328_p1 }
  0x85   : > { %p3004_p10 = pneg %p3003_p8 }
  0x87   : > { %p3009_p0 = pnand %p3007_p11, %p3004_p10 }
  0x89   : > { %3012 = shalt.err (!%p3009_p0)
}
  0x8a   : > { %s3013_s18 = scalar_lea.vmem %s469_s30, 512  ;;  %p3021_p6 = scmp.lt.s32.totalorder %s469_s30, %s469_s30 }
  0x8b   : > { %p3014_p2 = scmp.ne.s32.totalorder %s469_s30, %s3013_s18  ;;  %p3022_p7 = scmp.lt.s32.totalorder %s3013_s18, %s3013_s18 }
  0x8d   : > { %p3016_p3 = pnand %p3014_p2, %p3328_p1  ;;  %p3023_p9 = por %p3022_p7, %p3021_p6 }
  0x8f   : > { %p3017_p5 = pneg %p3016_p3 }
  0x91   : > { %p3024_p12 = pnand %p3023_p9, %p3017_p5 }
  0x93   : > { %3027 = shalt.err (!%p3024_p12)
}
  0x94   : > { %2742 = dma.hbm_to_vmem [thread:$0]  (!%p3314_p13), %s3900_s9, 512, %s469_s30, [#allocation13], %s3154_s29, %s3154_s29, %s3155_s25  }
  0x95   : > { %s3028_s19 = scalar_lea.hbm %s3901_s10, 512 }
  0x96   : > { %p3029_p4 = scmp.ne.s32.totalorder %s3901_s10, %s3028_s19  ;;  %p3035_p11 = scmp.lt.u32.totalorder %s3028_s19, %s3901_s10 }
  0x98   : > { %p3031_p8 = pnand %p3029_p4, %p3328_p1 }
  0x9a   : > { %p3032_p10 = pneg %p3031_p8 }
  0x9c   : > { %p3037_p0 = pnand %p3035_p11, %p3032_p10 }
  0x9e   : > { %3040 = shalt.err (!%p3037_p0)
}
  0x9f   : > { %s3041_s23 = scalar_lea.vmem %s482_s14, 512  ;;  %p3049_p6 = scmp.lt.s32.totalorder %s482_s14, %s482_s14 }
  0xa0   : > { %p3042_p2 = scmp.ne.s32.totalorder %s482_s14, %s3041_s23  ;;  %p3050_p7 = scmp.lt.s32.totalorder %s3041_s23, %s3041_s23 }
  0xa2   : > { %p3044_p3 = pnand %p3042_p2, %p3328_p1  ;;  %p3051_p9 = por %p3050_p7, %p3049_p6 }
  0xa4   : > { %p3045_p5 = pneg %p3044_p3 }
  0xa6   : > { %p3052_p12 = pnand %p3051_p9, %p3045_p5 }
  0xa8   : > { %3055 = shalt.err (!%p3052_p12)
}
  0xa9   : > { %2745 = dma.hbm_to_vmem [thread:$0]  (!%p3314_p13), %s3901_s10, 512, %s482_s14, [#allocation16], %s3154_s29, %s3154_s29, %s3155_s25  }
  0xaa   : > { %p3941_p4 = scmp.ne.s32.totalorder %s3936_s27, 0 }
  0xab   : > { %p3942_p1 = scmp.ne.s32.totalorder (!%p3941_p4), %s3937_s28, 0 }
  0xac   : > { %545 = sbr.rel (%p3941_p4) target bundleno = 2473 (0x9a9), region = 76 }
  0xb3   : > { %3109 = dma.done.wait (%p3942_p1), [#allocation7], 512  }
  0xb4   : > { %3111 = vsyncadd (%p3942_p1), [#allocation7], 4294966784 }
  0xb5   : > { %3113 = dma.done.wait (%p3942_p1), [#allocation10], 1024  }
  0xb6   : > { %3115 = vsyncadd (%p3942_p1), [#allocation10], 4294966272 }
  0xb7   : > { %3117 = dma.done.wait (%p3942_p1), [#allocation13], 1024  }
  0xb8   : > { %3119 = vsyncadd (%p3942_p1), [#allocation13], 4294966272 }
  0xb9   : > { %3121 = dma.done.wait (%p3942_p1), [#allocation16], 512  }
  0xba   : > { %3123 = vsyncadd (%p3942_p1), [#allocation16], 4294966784  ;;  %p634_p13 = scmp.lt.s32.totalorder %s3142_s16, 1  ;;  %v671_v0 = vld [vmem:[#allocation6] sm:$0xff]  ;;  %v672_v1 = vld [vmem:[#allocation6 + $0x8] sm:$0xff]  ;;  %vm675_vm0 = vcmask 261120  }
  0xbb   : > { %v789_v2 = vld [vmem:[#allocation9] sm:$0xff]  ;;  %v2635_v3 = vpack.c.bf16 %v672_v1, %v671_v0  ;;  %v790_v4 = vld [vmem:[#allocation9 + $0x8] sm:$0xff]  ;;  %v673_v5 = vld [vmem:[#allocation6 + $0x10] sm:$0xff]  ;;  %vm776_vm1 = vcmask 64512   ;;  %v3160_v16 = vmov 0.0   ;;  %vm3161_vm2 = vmmov 0  }
  0xbc   : > { %s635_s21 = scalar_select %p634_p13, %s3142_s16, 1  ;;  %v674_v6 = vld [vmem:[#allocation6 + $0x18] sm:$0xff]  ;;  %v2643_v7 = vpack.c.bf16 %v790_v4, %v789_v2  ;;  %v791_v9 = vld [vmem:[#allocation9 + $0x10] sm:$0xff]  ;;  %777 = vst.msk [vmem:[#allocation5] sm:$0xff] %vm776_vm1, %v3160_v16  ;;  %778 = vst.msk [vmem:[#allocation5 + $0x8] sm:$0xff] %vm776_vm1, %v3160_v16  ;;  %vm1013_vm3 = vcmask 130048  }
  0xbd   : > { %v2639_v8 = vpack.c.bf16 %v674_v6, %v673_v5  ;;  %v792_v10 = vld [vmem:[#allocation9 + $0x18] sm:$0xff]  ;;  %2636 = vmatprep.subr.bf16.mxu0 %v2635_v3  ;;  %779 = vst.msk [vmem:[#allocation5 + $0x10] sm:$0xff] %vm776_vm1, %v3160_v16  ;;  %780 = vst.msk [vmem:[#allocation5 + $0x18] sm:$0xff] %vm776_vm1, %v3160_v16  ;;  %s3162_s4 = smov 112   ;;  %s3163_s13 = smov 120   ;;  %v876_v25 = vld [vmem:[#allocation11] sm:$0xff] }
  0xbe   : > { %s3477_s27 = sshll.u32 %s635_s21, 4  ;;  %v2647_v12 = vpack.c.bf16 %v792_v10, %v791_v9  ;;  %2644 = vmatprep.subr.bf16.mxu1 %v2643_v7  ;;  %2638 = vmatpush3.bf16.msra.mxu0 %v2635_v3  ;;  %781 = vst.msk [vmem:[#allocation5 + $0x20] sm:$0xff] %vm776_vm1, %v3160_v16  ;;  %782 = vst.msk [vmem:[#allocation5 + $0x28] sm:$0xff] %vm776_vm1, %v3160_v16  ;;  %s3164_s15 = smov 104   ;;  %v877_v26 = vld [vmem:[#allocation11 + $0x8] sm:$0xff]  ;;  %v878_v27 = vld [vmem:[#allocation11 + $0x10] sm:$0xff] }
  0xbf   : > { %s3483_s25 = scalar_lea.vmem %s3891_s0, %s3477_s27  ;;  %s651_s17 = scalar_lea.vmem %s3892_s1, %s3477_s27  ;;  %2646 = vmatpush3.bf16.msra.mxu1 %v2643_v7  ;;  %2640 = vmatprep.subr.bf16.mxu0 %v2639_v8  ;;  %783 = vst.msk [vmem:[#allocation5 + $0x30] sm:$0xff] %vm776_vm1, %v3160_v16  ;;  %784 = vst.msk [vmem:[#allocation5 + $0x38] sm:$0xff] %vm776_vm1, %v3160_v16  ;;  %v2651_v28 = vpack.c.bf16 %v877_v26, %v876_v25  ;;  %v879_v29 = vld [vmem:[#allocation11 + $0x18] sm:$0xff]  ;;  %vm759_vm4 = vcmask 7168   ;;  %v3165_v48 = vmov -inf   ;;  %v3166_v49 = vmov 0  }
  0xc0   : > { %v669_v11 = vld [vmem:[%s3483_s25] sm:$0xff]  ;;  %2648 = vmatprep.subr.bf16.mxu1 %v2647_v12  ;;  %v670_v14 = vld [vmem:[%s3483_s25 + $0x8] sm:$0xff]  ;;  %s661_s26 = scalar_lea.vmem %s3893_s2, %s3477_s27  ;;  %v2655_v31 = vpack.c.bf16 %v879_v29, %v878_v27  ;;  %760 = vst.msk [vmem:[#allocation3] sm:$0xff] %vm759_vm4, %v3165_v48  ;;  %761 = vst.msk [vmem:[#allocation3 + $0x8] sm:$0xff] %vm759_vm4, %v3165_v48  ;;  %2830 = vset.pattern.permute.xlu1 %v3166_v49  ;;  %s3167_s24 = smov 8   ;;  %vm1736_vm5 = vcmask 195584  }
  0xc1   : > { %2510 = vmatprep.mubr.msk.f32.mxu0 %vm675_vm0, %v669_v11  ;;  %v785_v13 = vld [vmem:[%s651_s17] sm:$0xff]  ;;  %v786_v15 = vld [vmem:[%s651_s17 + $0x8] sm:$0xff]  ;;  %762 = vst.msk [vmem:[#allocation3 + $0x10] sm:$0xff] %vm759_vm4, %v3165_v48  ;;  %763 = vst.msk [vmem:[#allocation3 + $0x18] sm:$0xff] %vm759_vm4, %v3165_v48  ;;  %2831 = vset.pattern.permute.xlu0 %v3166_v49  ;;  %s3168_s12 = smov 16   ;;  %s3169_s23 = smov 24  }
  0xc2   : > { %2521 = vmatprep.mubr.msk.f32.mxu1 %vm675_vm0, %v785_v13  ;;  %2642 = vmatpush3.bf16.msra.mxu0 %v2639_v8  ;;  %v787_v30 = vld [vmem:[%s661_s26] sm:$0xff]  ;;  %v788_v32 = vld [vmem:[%s661_s26 + $0x8] sm:$0xff]  ;;  %764 = vst.msk [vmem:[#allocation3 + $0x20] sm:$0xff] %vm759_vm4, %v3165_v48  ;;  %765 = vst.msk [vmem:[#allocation3 + $0x28] sm:$0xff] %vm759_vm4, %v3165_v48  ;;  %vm2053_vm6 = vcmask 523264   ;;  %s3944_s14 = sld [smem:[#allocation33_spill]] }
  0xc3   : > { %2650 = vmatpush3.bf16.msra.mxu1 %v2647_v12  ;;  %2652 = vmatprep.subr.bf16.mxu0 %v2651_v28  ;;  %766 = vst.msk [vmem:[#allocation3 + $0x30] sm:$0xff] %vm759_vm4, %v3165_v48  ;;  %767 = vst.msk [vmem:[#allocation3 + $0x38] sm:$0xff] %vm759_vm4, %v3165_v48  ;;  %s2439_s19 = sshll.u32 %s3142_s16, 8  ;;  %s3947_s30 = sld [smem:[#allocation35_spill]] }
  0xc4   : > { %2535 = vmatprep.subr.bf16.mxu1 %v3160_v16  ;;  %768 = vst.msk [vmem:[#allocation4] sm:$0xff] %vm759_vm4, %v3160_v16  ;;  %769 = vst.msk [vmem:[#allocation4 + $0x8] sm:$0xff] %vm759_vm4, %v3160_v16 }
  0xc5   : > { %2511 = vmatmul.mubr.msk.f32.vlgmr.msra.gmra.mrb[0].mxu0 %vm675_vm0, %v670_v14  ;;  %770 = vst.msk [vmem:[#allocation4 + $0x10] sm:$0xff] %vm759_vm4, %v3160_v16  ;;  %771 = vst.msk [vmem:[#allocation4 + $0x18] sm:$0xff] %vm759_vm4, %v3160_v16 }
  0xc6   : > { %2522 = vmatmul.mubr.msk.f32.vlgmr.msra.gmra.mrb[0].mxu1 %vm675_vm0, %v786_v15  ;;  %2532 = vmatprep.mubr.msk.f32.mxu0 %vm675_vm0, %v787_v30  ;;  %772 = vst.msk [vmem:[#allocation4 + $0x20] sm:$0xff] %vm759_vm4, %v3160_v16  ;;  %773 = vst.msk [vmem:[#allocation4 + $0x28] sm:$0xff] %vm759_vm4, %v3160_v16 }
  0xc7   : > { %2537 = vmatprep.mubr.msk.bf16.mxu1 %vm3161_vm2, %v3160_v16  ;;  %2654 = vmatpush3.bf16.msra.mxu0 %v2651_v28  ;;  %774 = vst.msk [vmem:[#allocation4 + $0x30] sm:$0xff] %vm759_vm4, %v3160_v16  ;;  %775 = vst.msk [vmem:[#allocation4 + $0x38] sm:$0xff] %vm759_vm4, %v3160_v16  ;;  %v3603_v4 = vld [vmem:[#allocation3] sm:$0xff]  ;;  %v3605_v6 = vld [vmem:[#allocation3 + $0x8] sm:$0xff] }
  0xc8   : > { %2656 = vmatprep.subr.bf16.mxu0 %v2655_v31  ;;  %v3625_v15 = vld [vmem:[#allocation3 + $0x10] sm:$0xff] }
  0xc9   : > { %v3647_v26 = vld [vmem:[#allocation3 + $0x28] sm:$0xff]  ;;  %s3948_s21 = smov %s3947_s30  ;;  %s3837_s18 = scalar_lea.hbm %s3947_s30, %s2439_s19 }
  0xcb   : > { %2658 = vmatpush3.bf16.msra.mxu0 %v2655_v31 }
  0xcc   : > { %2541 = vmatprep.subr.bf16.mxu0 %v3160_v16 }
  0xce   : > { %2533 = vmatmul.mubr.msk.f32.vlgmr.msra.gmra.mrb[2].mxu0 %vm675_vm0, %v788_v32  ;;  %v3664_v32 = vld [vmem:[#allocation3 + $0x30] sm:$0xff] }
  0xcf   : > { %2543 = vmatprep.mubr.msk.bf16.mxu0 %vm3161_vm2, %v3160_v16 }
 0x198   : > { %v2512_v17 = vpop.f32.mrb[0].mxu0 }
 0x199   : > { %v2523_v18 = vpop.f32.mrb[0].mxu1  ;;  %v748_v19 = vpop.f32.mrb[1].mxu0 }
 0x19a   : > { %v757_v20 = vpack.c.bf16 %v2512_v17, %v748_v19  ;;  %v866_v21 = vpop.f32.mrb[1].mxu1  ;;  %v3630_v19 = vld [vmem:[#allocation3 + $0x18] sm:$0xff] }
 0x19b   : > { %v875_v22 = vpack.c.bf16 %v2523_v18, %v866_v21 }
 0x19c   : > { %758 = vst.msk [vmem:[#allocation2] sm:$0xff] %vm675_vm0, %v757_v20 }
 0x19d   : > { %1297 = vrot.lane.b32.xlu1 %v875_v22, %s3162_s4  ;;  %1128 = vrot.lane.b32.xlu0 %v875_v22, %s3163_s13  ;;  %v968_v23 = vsel %vm776_vm1, %v875_v22, 0 }
 0x19e   : > { %2536 = vmatpush3.bf16.xpose.msra.mxu1 %v968_v23  ;;  %v3640_v23 = vld [vmem:[#allocation3 + $0x20] sm:$0xff] }
 0x19f   : > { %2547 = vmatprep.subr.bf16.mxu1 %v3160_v16 }
 0x1a1   : > { %v2534_v12 = vpop.f32.mrb[2].mxu0 }
 0x1a2   : > { %v952_v13 = vpop.f32.mrb[3].mxu0 }
 0x1a3   : > { %v962_v24 = vld [vmem:[#allocation2] sm:$0xff]  ;;  %v961_v14 = vpack.c.bf16 %v2534_v12, %v952_v13 }
 0x1a4   : > { %1295 = vrot.lane.b32.xlu1 %v962_v24, %s3162_s4  ;;  %1125 = vrot.lane.b32.xlu0 %v962_v24, %s3163_s13 }
 0x1a5   : > { %2538 = vmatmul.mubr.msk.bf16.vlgmr.msra.gmra.mrb[4].mxu1 %vm776_vm1, %v962_v24  ;;  %2542 = vmatpush3.bf16.msra.mxu0 %v961_v14 }
 0x1a6   : > { %2549 = vmatprep.mubr.msk.bf16.mxu1 %vm3161_vm2, %v3160_v16  ;;  %2553 = vmatprep.subr.bf16.mxu0 %v3160_v16 }
 0x1a8   : > { %1463 = vrot.lane.b32.xlu1 %v962_v24, %s3164_s15  ;;  %1465 = vrot.lane.b32.xlu0 %v875_v22, %s3164_s15 }
 0x20f   : > { %v1129_v33 = vpop.permute.xlu0 %1128  ;;  %v1298_v35 = vpop.permute.xlu1 %1297 }
 0x210   : > { %v1134_v34 = vsel %vm776_vm1, %v1129_v33, 0  ;;  %v1303_v37 = vsel %vm776_vm1, %v1298_v35, 0 }
 0x211   : > { %2548 = vmatpush3.bf16.xpose.msra.mxu1 %v1134_v34  ;;  %v3667_v34 = vld [vmem:[#allocation3 + $0x38] sm:$0xff] }
 0x212   : > { %2559 = vmatprep.subr.bf16.mxu1 %v3160_v16 }
 0x216   : > { %v1126_v36 = vpop.permute.xlu0 %1125  ;;  %v1296_v39 = vpop.permute.xlu1 %1295 }
 0x218   : > { %2550 = vmatmul.mubr.msk.bf16.vlgmr.msra.gmra.mrb[8].mxu1 %vm776_vm1, %v1126_v36 }
 0x219   : > { %2560 = vmatpush3.bf16.xpose.msra.mxu1 %v1303_v37  ;;  %2561 = vmatprep.mubr.msk.bf16.mxu1 %vm3161_vm2, %v3160_v16 }
 0x21a   : > { %2571 = vmatprep.subr.bf16.mxu1 %v3160_v16  ;;  %v1466_v38 = vpop.permute.xlu0 %1465  ;;  %v1464_v41 = vpop.permute.xlu1 %1463 }
 0x21b   : > { %v1471_v40 = vsel %vm776_vm1, %v1466_v38, 0 }
 0x220   : > { %2562 = vmatmul.mubr.msk.bf16.vlgmr.msra.gmra.mrb[12].mxu1 %vm776_vm1, %v1296_v39 }
 0x221   : > { %2572 = vmatpush3.bf16.xpose.msra.mxu1 %v1471_v40  ;;  %2573 = vmatprep.mubr.msk.bf16.mxu1 %vm3161_vm2, %v3160_v16 }
 0x228   : > { %2574 = vmatmul.mubr.msk.bf16.vlgmr.msra.gmra.mrb[16].mxu1 %vm776_vm1, %v1464_v41 }
 0x278   : > { %v3547_v42 = vpop.f32.mrb[4].mxu1 }
 0x279   : > { %v2539_v43 = vpop.f32.mrb[5].mxu1  ;;  %v1014_v44 = vsel %vm1013_vm3, %v3547_v42, -inf }
 0x27a   : > { %1015 = vmax.xlane.f32.xlu0 %v1014_v44  ;;  %v3551_v45 = vpop.f32.mrb[6].mxu1 }
 0x27b   : > { %v2540_v46 = vpop.f32.mrb[7].mxu1  ;;  %v1017_v47 = vsel %vm1013_vm3, %v3551_v45, -inf }
 0x27c   : > { %1018 = vmax.xlane.f32.xlu1 %v1017_v47 }
 0x2eb   : > { %v3579_v50 = vpop.f32.mrb[8].mxu1 }
 0x2ec   : > { %v2551_v51 = vpop.f32.mrb[9].mxu1  ;;  %v1180_v52 = vsel %vm1013_vm3, %v3579_v50, -inf }
 0x2ed   : > { %1181 = vmax.xlane.f32.xlu0 %v1180_v52  ;;  %v3583_v53 = vpop.f32.mrb[10].mxu1 }
 0x2ee   : > { %v2552_v54 = vpop.f32.mrb[11].mxu1  ;;  %v1183_v55 = vsel %vm1013_vm3, %v3583_v53, -inf }
 0x2f1   : > { %1184 = vmax.xlane.f32.xlu0 %v1183_v55 }
 0x2f3   : > { %v3587_v56 = vpop.f32.mrb[12].mxu1 }
 0x2f4   : > { %v2563_v57 = vpop.f32.mrb[13].mxu1  ;;  %v1349_v58 = vsel %vm1013_vm3, %v3587_v56, -inf }
 0x2f5   : > { %1350 = vmax.xlane.f32.xlu1 %v1349_v58  ;;  %v3591_v59 = vpop.f32.mrb[14].mxu1 }
 0x2f6   : > { %v2564_v60 = vpop.f32.mrb[15].mxu1  ;;  %v1352_v61 = vsel %vm1013_vm3, %v3591_v59, -inf }
 0x2f7   : > { %1353 = vmax.xlane.f32.xlu0 %v1352_v61 }
 0x2fb   : > { %v3595_v62 = vpop.f32.mrb[16].mxu1 }
 0x2fc   : > { %v2575_v63 = vpop.f32.mrb[17].mxu1  ;;  %v1517_v0 = vsel %vm1013_vm3, %v3595_v62, -inf }
 0x2fd   : > { %1518 = vmax.xlane.f32.xlu1 %v1517_v0  ;;  %v3599_v1 = vpop.f32.mrb[18].mxu1 }
 0x2fe   : > { %v2576_v2 = vpop.f32.mrb[19].mxu1  ;;  %v1520_v3 = vsel %vm1013_vm3, %v3599_v1, -inf }
 0x2ff   : > { %1521 = vmax.xlane.f32.xlu0 %v1520_v3 }
 0x307   : > { %v1016_v5 = vpop.xlane.xlu0 %1015 }
 0x308   : > { %v3608_v7 = vmax.f32 %v3603_v4, %v1016_v5 }
 0x309   : > { %v1019_v8 = vpop.xlane.xlu1 %1018 }
 0x30a   : > { %v1022_v9 = vsub.f32 %v3603_v4, %v3608_v7  ;;  %1122 = vst.msk [vmem:[#allocation3] sm:$0xff] %vm759_vm4, %v3608_v7  ;;  %v3615_v10 = vmax.f32 %v3605_v6, %v1019_v8 }
 0x30c   : > { %v1023_v11 = vsub.f32 %v3605_v6, %v3615_v10  ;;  %1123 = vst.msk [vmem:[#allocation3 + $0x8] sm:$0xff] %vm759_vm4, %v3615_v10 }
 0x30e   : > { %1030 = vperm.xlu1 %2830, %v3608_v7  }
 0x315   : > { %1035 = vperm.xlu0 %2831, %v3615_v10  }
 0x319   : > { %1563 = vrot.lane.b32.xlu0 %v961_v14, %s3164_s15  ;;  %s3946_s15 = sld [smem:[#allocation29_spill]] }
 0x31f   : > { %p3949_p10 = scmp.ne.s32.totalorder %s3946_s15, 0 }
 0x37a   : > { %v1182_v17 = vpop.xlane.xlu0 %1181 }
 0x37b   : > { %v3628_v18 = vmax.f32 %v3625_v15, %v1182_v17 }
 0x37d   : > { %v1188_v20 = vsub.f32 %v3625_v15, %v3628_v18  ;;  %1293 = vst.msk [vmem:[#allocation3 + $0x10] sm:$0xff] %vm759_vm4, %v3628_v18  ;;  %1196 = vperm.xlu1 %2830, %v3628_v18  }
 0x37e   : > { %v1185_v21 = vpop.xlane.xlu0 %1184 }
 0x37f   : > { %v3638_v22 = vmax.f32 %v3630_v19, %v1185_v21 }
 0x381   : > { %v1189_v24 = vsub.f32 %v3630_v19, %v3638_v22  ;;  %1294 = vst.msk [vmem:[#allocation3 + $0x18] sm:$0xff] %vm759_vm4, %v3638_v22  ;;  %1201 = vperm.xlu1 %2830, %v3638_v22  }
 0x382   : > { %v1351_v25 = vpop.xlane.xlu1 %1350 }
 0x383   : > { %v3650_v27 = vmax.f32 %v3640_v23, %v1351_v25 }
 0x384   : > { %v1354_v28 = vpop.xlane.xlu0 %1353 }
 0x385   : > { %v1357_v29 = vsub.f32 %v3640_v23, %v3650_v27  ;;  %1461 = vst.msk [vmem:[#allocation3 + $0x20] sm:$0xff] %vm759_vm4, %v3650_v27  ;;  %v3657_v30 = vmax.f32 %v3647_v26, %v1354_v28  ;;  %1365 = vperm.xlu1 %2830, %v3650_v27  }
 0x387   : > { %v1358_v31 = vsub.f32 %v3647_v26, %v3657_v30  ;;  %1462 = vst.msk [vmem:[#allocation3 + $0x28] sm:$0xff] %vm759_vm4, %v3657_v30 }
 0x389   : > { %1370 = vperm.xlu1 %2830, %v3657_v30  }
 0x38a   : > { %v1519_v33 = vpop.xlane.xlu1 %1518 }
 0x38b   : > { %v3670_v35 = vmax.f32 %v3664_v32, %v1519_v33 }
 0x38c   : > { %v1522_v36 = vpop.xlane.xlu0 %1521 }
 0x38d   : > { %v1525_v37 = vsub.f32 %v3664_v32, %v3670_v35  ;;  %1629 = vst.msk [vmem:[#allocation3 + $0x30] sm:$0xff] %vm759_vm4, %v3670_v35  ;;  %v3677_v38 = vmax.f32 %v3667_v34, %v1522_v36  ;;  %1533 = vperm.xlu1 %2830, %v3670_v35   ;;  %v1211_v32 = vld [vmem:[#allocation4 + $0x10] sm:$0xff] }
 0x38e   : > { %v1031_v39 = vpop.permute.xlu1 %1030 }
 0x38f   : > { %v1526_v40 = vsub.f32 %v3667_v34, %v3677_v38  ;;  %1630 = vst.msk [vmem:[#allocation3 + $0x38] sm:$0xff] %vm759_vm4, %v3677_v38  ;;  %v1038_v41 = vsub.f32 %v3547_v42, %v1031_v39  ;;  %v1527_v19 = vmul.f32 1.442695, %v1525_v37  ;;  %v1212_v37 = vld [vmem:[#allocation4 + $0x18] sm:$0xff] }
 0x391   : > { %1538 = vperm.xlu1 %2830, %v3677_v38   ;;  %v1040_v43 = vmul.f32 1.442695, %v1038_v41  ;;  %v1529_v15 = vmul.f32 1.442695, %v1526_v40  ;;  %v1024_v40 = vmul.f32 1.442695, %v1022_v9 }
 0x393   : > { %2832 = vpow2.f32 %v1040_v43 }
 0x394   : > { %v1036_v44 = vpop.permute.xlu0 %1035 }
 0x395   : > { %v1039_v46 = vsub.f32 %v3551_v45, %v1036_v44  ;;  %1227 = vrot.lane.b32.xlu1 %v961_v14, %s3163_s13  ;;  %s3945_s13 = sld [smem:[#allocation34_spill]] }
 0x397   : > { %v1042_v47 = vmul.f32 1.442695, %v1039_v46 }
 0x398   : > { %v1564_v44 = vpop.permute.xlu0 %1563 }
 0x399   : > { %2834 = vpow2.f32 %v1042_v47  ;;  %1395 = vrot.lane.b32.xlu1 %v961_v14, %s3162_s4 }
 0x39d   : > { %v2833_v48 = vpop.eup %2832 }
 0x39e   : > { %v1048_v46 = vsel %vm1013_vm3, %v2833_v48, 0.0 }
 0x3a3   : > { %v3689_v49 = vpop.eup %2834 }
 0x3a4   : > { %v1059_v51 = vpack.c.bf16 %v3689_v49, %v2833_v48  ;;  %v1190_v48 = vmul.f32 1.442695, %v1188_v20 }
 0x3a6   : > { %2544 = vmatmul.mubr.msk.bf16.vlgmr.msra.gmra.mrb[4].mxu0 %vm1013_vm3, %v1059_v51 }
 0x3a7   : > { %2555 = vmatprep.mubr.msk.bf16.mxu0 %vm3161_vm2, %v3160_v16 }
 0x3fc   : > { %v1197_v42 = vpop.permute.xlu1 %1196 }
 0x3fd   : > { %v1204_v45 = vsub.f32 %v3579_v50, %v1197_v42  ;;  %v1051_v42 = vsel %vm1013_vm3, %v3689_v49, 0.0 }
 0x3ff   : > { %v1206_v52 = vmul.f32 1.442695, %v1204_v45  ;;  %v1192_v45 = vmul.f32 1.442695, %v1189_v24 }
 0x400   : > { %v1202_v54 = vpop.permute.xlu1 %1201 }
 0x401   : > { %2836 = vpow2.f32 %v1206_v52  ;;  %v1205_v55 = vsub.f32 %v3583_v53, %v1202_v54  ;;  %v1359_v52 = vmul.f32 1.442695, %v1357_v29 }
 0x403   : > { %v1208_v57 = vmul.f32 1.442695, %v1205_v55  ;;  %v1380_v55 = vld [vmem:[#allocation4 + $0x20] sm:$0xff] }
 0x404   : > { %v1366_v58 = vpop.permute.xlu1 %1365 }
 0x405   : > { %2838 = vpow2.f32 %v1208_v57  ;;  %v1373_v60 = vsub.f32 %v3587_v56, %v1366_v58  ;;  %v1026_v58 = vmul.f32 1.442695, %v1023_v11 }
 0x407   : > { %v1375_v61 = vmul.f32 1.442695, %v1373_v60 }
 0x408   : > { %v1371_v63 = vpop.permute.xlu1 %1370 }
 0x409   : > { %2840 = vpow2.f32 %v1375_v61  ;;  %v1374_v0 = vsub.f32 %v3591_v59, %v1371_v63  ;;  %v1381_v63 = vld [vmem:[#allocation4 + $0x28] sm:$0xff] }
 0x40b   : > { %v2837_v2 = vpop.eup %2836  ;;  %v1377_v3 = vmul.f32 1.442695, %v1374_v0 }
 0x40c   : > { %v1534_v5 = vpop.permute.xlu1 %1533  ;;  %v1215_v50 = vsel %vm1013_vm3, %v2837_v2, 0.0 }
 0x40d   : > { %2842 = vpow2.f32 %v1377_v3  ;;  %v1541_v8 = vsub.f32 %v3595_v62, %v1534_v5  ;;  %1216 = vadd.xlane.f32.xlu1 %v1215_v50  ;;  %v1549_v50 = vld [vmem:[#allocation4 + $0x38] sm:$0xff] }
 0x40f   : > { %v2839_v53 = vpop.eup %2838  ;;  %v1543_v12 = vmul.f32 1.442695, %v1541_v8  ;;  %v1044_v8 = vld [vmem:[#allocation4] sm:$0xff] }
 0x410   : > { %v1539_v13 = vpop.permute.xlu1 %1538  ;;  %v1218_v14 = vsel %vm1013_vm3, %v2839_v53, 0.0  ;;  %v1225_v56 = vpack.c.bf16 %v2839_v53, %v2837_v2  ;;  %v1548_v2 = vld [vmem:[#allocation4 + $0x30] sm:$0xff] }
 0x411   : > { %2844 = vpow2.f32 %v1543_v12  ;;  %v1542_v17 = vsub.f32 %v3599_v1, %v1539_v13  ;;  %1219 = vadd.xlane.f32.xlu0 %v1218_v14 }
 0x413   : > { %v2841_v59 = vpop.eup %2840  ;;  %v1545_v21 = vmul.f32 1.442695, %v1542_v17 }
 0x414   : > { %v1228_v25 = vpop.permute.xlu1 %1227  ;;  %v1384_v28 = vsel %vm1013_vm3, %v2841_v59, 0.0 }
 0x415   : > { %2846 = vpow2.f32 %v1545_v21  ;;  %1385 = vadd.xlane.f32.xlu0 %v1384_v28  ;;  %2554 = vmatpush3.bf16.msra.mxu0 %v1228_v25  ;;  %v1045_v21 = vld [vmem:[#allocation4 + $0x8] sm:$0xff] }
 0x416   : > { %2565 = vmatprep.subr.bf16.mxu0 %v3160_v16  ;;  %2848 = vpow2.f32 %v1192_v45 }
 0x417   : > { %v2843_v62 = vpop.eup %2842  ;;  %2850 = vpow2.f32 %v1190_v48 }
 0x418   : > { %2556 = vmatmul.mubr.msk.bf16.vlgmr.msra.gmra.mrb[8].mxu0 %vm1013_vm3, %v1225_v56  ;;  %v1387_v33 = vsel %vm1013_vm3, %v2843_v62, 0.0  ;;  %v1396_v36 = vpop.permute.xlu1 %1395  ;;  %v1394_v39 = vpack.c.bf16 %v2843_v62, %v2841_v59  ;;  %2852 = vpow2.f32 %v1359_v52 }
 0x419   : > { %1388 = vadd.xlane.f32.xlu1 %v1387_v33  ;;  %2566 = vmatpush3.bf16.msra.mxu0 %v1396_v36 }
 0x41a   : > { %2567 = vmatprep.mubr.msk.bf16.mxu0 %vm3161_vm2, %v3160_v16  ;;  %2577 = vmatprep.subr.bf16.mxu0 %v3160_v16 }
 0x41b   : > { %v2845_v1 = vpop.eup %2844 }
 0x41c   : > { %v1552_v41 = vsel %vm1013_vm3, %v2845_v1, 0.0 }
 0x41d   : > { %1553 = vadd.xlane.f32.xlu0 %v1552_v41 }
 0x41f   : > { %v2847_v43 = vpop.eup %2846 }
 0x420   : > { %2568 = vmatmul.mubr.msk.bf16.vlgmr.msra.gmra.mrb[12].mxu0 %vm1013_vm3, %v1394_v39  ;;  %v1555_v47 = vsel %vm1013_vm3, %v2847_v43, 0.0  ;;  %v1562_v51 = vpack.c.bf16 %v2847_v43, %v2845_v1  ;;  %v2849_v18 = vpop.eup %2848 }
 0x421   : > { %1049 = vadd.xlane.f32.xlu0 %v1048_v46  ;;  %1556 = vadd.xlane.f32.xlu1 %v1555_v47  ;;  %v2851_v20 = vpop.eup %2850  ;;  %v1214_v49 = vmul.f32 %v2849_v18, %v1212_v37 }
 0x422   : > { %2578 = vmatpush3.bf16.msra.mxu0 %v1564_v44  ;;  %2579 = vmatprep.mubr.msk.bf16.mxu0 %vm3161_vm2, %v3160_v16  ;;  %v1361_v16 = vmul.f32 1.442695, %v1358_v31  ;;  %v2853_v22 = vpop.eup %2852  ;;  %v1213_v34 = vmul.f32 %v2851_v20, %v1211_v32 }
 0x423   : > { %v1382_v60 = vmul.f32 %v2853_v22, %v1380_v55 }
 0x424   : > { %2854 = vpow2.f32 %v1361_v16 }
 0x425   : > { %1052 = vadd.xlane.f32.xlu1 %v1051_v42  ;;  %2856 = vpow2.f32 %v1527_v19  ;;  %v1275_v19 = vld [vmem:[#allocation5 + $0x10] sm:$0xff] }
 0x426   : > { %2858 = vpow2.f32 %v1529_v15 }
 0x427   : > { %2860 = vpow2.f32 %v1024_v40 }
 0x428   : > { %2580 = vmatmul.mubr.msk.bf16.vlgmr.msra.gmra.mrb[16].mxu0 %vm1013_vm3, %v1562_v51  ;;  %2862 = vpow2.f32 %v1026_v58 }
 0x42e   : > { %v2855_v23 = vpop.eup %2854 }
 0x42f   : > { %v2857_v24 = vpop.eup %2856  ;;  %v1383_v7 = vmul.f32 %v2855_v23, %v1381_v63 }
 0x430   : > { %v2859_v26 = vpop.eup %2858  ;;  %v1550_v6 = vmul.f32 %v2857_v24, %v1548_v2 }
 0x431   : > { %v2861_v10 = vpop.eup %2860  ;;  %v1551_v13 = vmul.f32 %v2859_v26, %v1549_v50 }
 0x432   : > { %v1046_v14 = vmul.f32 %v2861_v10, %v1044_v8  ;;  %v2863_v56 = vpop.eup %2862 }
 0x433   : > { %v1047_v36 = vmul.f32 %v2863_v56, %v1045_v21 }
 0x436   : > { %1284 = vperm.xlu1 %2830, %v2849_v18   ;;  %v1276_v18 = vld [vmem:[#allocation5 + $0x18] sm:$0xff] }
 0x437   : > { %1279 = vperm.xlu0 %2831, %v2851_v20  }
 0x43a   : > { %1447 = vperm.xlu1 %2830, %v2853_v22  }
 0x43b   : > { %1452 = vperm.xlu0 %2831, %v2855_v23  }
 0x43e   : > { %1615 = vperm.xlu1 %2830, %v2857_v24  }
 0x43f   : > { %1620 = vperm.xlu0 %2831, %v2859_v26  }
 0x479   : > { %v3737_v27 = vpop.f32.mrb[4].mxu0 }
 0x47a   : > { %v2545_v29 = vpop.f32.mrb[5].mxu0 }
 0x47b   : > { %v3739_v30 = vpop.f32.mrb[6].mxu0 }
 0x47c   : > { %v2546_v31 = vpop.f32.mrb[7].mxu0 }
 0x49a   : > { %v1217_v35 = vpop.xlane.xlu1 %1216 }
 0x49b   : > { %v1221_v38 = vadd.f32 %v1217_v35, %v1213_v34  ;;  %v1443_v35 = vld [vmem:[#allocation5 + $0x20] sm:$0xff] }
 0x49d   : > { %1223 = vst.msk [vmem:[#allocation4 + $0x10] sm:$0xff] %vm759_vm4, %v1221_v38  ;;  %v1444_v38 = vld [vmem:[#allocation5 + $0x28] sm:$0xff] }
 0x49e   : > { %v1220_v54 = vpop.xlane.xlu0 %1219 }
 0x49f   : > { %v1222_v57 = vadd.f32 %v1220_v54, %v1214_v49 }
 0x4a1   : > { %1224 = vst.msk [vmem:[#allocation4 + $0x18] sm:$0xff] %vm759_vm4, %v1222_v57 }
 0x4a2   : > { %v1386_v61 = vpop.xlane.xlu0 %1385 }
 0x4a3   : > { %v1390_v0 = vadd.f32 %v1386_v61, %v1382_v60 }
 0x4a4   : > { %v1656_v4 = vld [vmem:[#allocation4 + $0x10] sm:$0xff] }
 0x4a5   : > { %1392 = vst.msk [vmem:[#allocation4 + $0x20] sm:$0xff] %vm759_vm4, %v1390_v0  ;;  %2864 = vrcp.f32 %v1656_v4  ;;  %v1611_v0 = vld [vmem:[#allocation5 + $0x30] sm:$0xff] }
 0x4a6   : > { %v1389_v9 = vpop.xlane.xlu1 %1388 }
 0x4a7   : > { %v1391_v3 = vadd.f32 %v1389_v9, %v1383_v7  ;;  %v1612_v7 = vld [vmem:[#allocation5 + $0x38] sm:$0xff] }
 0x4a8   : > { %v1657_v5 = vld [vmem:[#allocation4 + $0x18] sm:$0xff] }
 0x4a9   : > { %1393 = vst.msk [vmem:[#allocation4 + $0x28] sm:$0xff] %vm759_vm4, %v1391_v3  ;;  %2866 = vrcp.f32 %v1657_v5 }
 0x4aa   : > { %v1554_v11 = vpop.xlane.xlu0 %1553 }
 0x4ab   : > { %v1558_v53 = vadd.f32 %v1554_v11, %v1550_v6 }
 0x4ac   : > { %v1674_v12 = vld [vmem:[#allocation4 + $0x20] sm:$0xff] }
 0x4ad   : > { %1560 = vst.msk [vmem:[#allocation4 + $0x30] sm:$0xff] %vm759_vm4, %v1558_v53  ;;  %2868 = vrcp.f32 %v1674_v12 }
 0x4ae   : > { %v1557_v17 = vpop.xlane.xlu1 %1556  ;;  %v1050_v59 = vpop.xlane.xlu0 %1049 }
 0x4af   : > { %v2865_v25 = vpop.eup %2864  ;;  %v1559_v28 = vadd.f32 %v1557_v17, %v1551_v13  ;;  %v1054_v62 = vadd.f32 %v1050_v59, %v1046_v14  ;;  %v1739_v14 = vld [vmem:[#allocation12] sm:$0xff] }
 0x4b0   : > { %1662 = vperm.xlu1 %2830, %v2865_v25   ;;  %v1675_v33 = vld [vmem:[#allocation4 + $0x28] sm:$0xff] }
 0x4b1   : > { %1561 = vst.msk [vmem:[#allocation4 + $0x38] sm:$0xff] %vm759_vm4, %v1559_v28  ;;  %1057 = vst.msk [vmem:[#allocation4] sm:$0xff] %vm759_vm4, %v1054_v62  ;;  %2870 = vrcp.f32 %v1675_v33  ;;  %v1741_v28 = vld [vmem:[#allocation12 + $0x10] sm:$0xff]  ;;  %v1742_v62 = vld [vmem:[#allocation12 + $0x18] sm:$0xff] }
 0x4b2   : > { %v1053_v39 = vpop.xlane.xlu1 %1052  ;;  %v2663_v33 = vpack.c.bf16 %v1742_v62, %v1741_v28  ;;  %v2049_v28 = vld [vmem:[%s3902_s11 + $0x20] sm:$0xff]  ;;  %v2050_v62 = vld [vmem:[%s3902_s11 + $0x28] sm:$0xff] }
 0x4b3   : > { %v2867_v1 = vpop.eup %2866  ;;  %v1055_v41 = vadd.f32 %v1053_v39, %v1047_v36 }
 0x4b4   : > { %1667 = vperm.xlu0 %2831, %v2867_v1   ;;  %v1692_v43 = vld [vmem:[#allocation4 + $0x30] sm:$0xff] }
 0x4b5   : > { %1058 = vst.msk [vmem:[#allocation4 + $0x8] sm:$0xff] %vm759_vm4, %v1055_v41  ;;  %2872 = vrcp.f32 %v1692_v43 }
 0x4b6   : > { %v1280_v15 = vpop.permute.xlu0 %1279  ;;  %v1285_v20 = vpop.permute.xlu1 %1284 }
 0x4b7   : > { %v2869_v44 = vpop.eup %2868  ;;  %v1287_v22 = vmul.f32 %v1280_v15, %v1275_v19  ;;  %v1288_v24 = vmul.f32 %v1285_v20, %v1276_v18  ;;  %v1105_v15 = vld [vmem:[#allocation5 + $0x8] sm:$0xff] }
 0x4b8   : > { %1680 = vperm.xlu1 %2830, %v2869_v44   ;;  %v1693_v46 = vld [vmem:[#allocation4 + $0x38] sm:$0xff]  ;;  %v1638_v47 = vld [vmem:[#allocation4] sm:$0xff] }
 0x4b9   : > { %2874 = vrcp.f32 %v1693_v46 }
 0x4ba   : > { %2876 = vrcp.f32 %v1638_v47  ;;  %v1448_v37 = vpop.permute.xlu1 %1447  ;;  %v1453_v40 = vpop.permute.xlu0 %1452 }
 0x4bb   : > { %v2871_v51 = vpop.eup %2870  ;;  %v1455_v49 = vmul.f32 %v1448_v37, %v1443_v35  ;;  %v1456_v55 = vmul.f32 %v1453_v40, %v1444_v38 }
 0x4bc   : > { %1685 = vperm.xlu0 %2831, %v2871_v51   ;;  %v1639_v42 = vld [vmem:[#allocation4 + $0x8] sm:$0xff] }
 0x4bd   : > { %2878 = vrcp.f32 %v1639_v42  ;;  %v1104_v42 = vld [vmem:[#allocation5] sm:$0xff] }
 0x4be   : > { %v1616_v4 = vpop.permute.xlu1 %1615  ;;  %v1621_v9 = vpop.permute.xlu0 %1620 }
 0x4bf   : > { %v2873_v45 = vpop.eup %2872  ;;  %v1623_v2 = vmul.f32 %v1616_v4, %v1611_v0  ;;  %v1624_v5 = vmul.f32 %v1621_v9, %v1612_v7 }
 0x4c0   : > { %1698 = vperm.xlu1 %2830, %v2873_v45  }
 0x4c3   : > { %v2875_v48 = vpop.eup %2874 }
 0x4c4   : > { %1703 = vperm.xlu0 %2831, %v2875_v48   ;;  %1108 = vperm.xlu1 %2830, %v2861_v10   ;;  %v2877_v52 = vpop.eup %2876 }
 0x4c7   : > { %v2879_v16 = vpop.eup %2878 }
 0x4c8   : > { %1113 = vperm.xlu0 %2831, %v2863_v56   ;;  %1644 = vperm.xlu1 %2830, %v2877_v52   ;;  %v1740_v56 = vld [vmem:[#allocation12 + $0x8] sm:$0xff] }
 0x4c9   : > { %v2659_v17 = vpack.c.bf16 %v1740_v56, %v1739_v14  ;;  %v2045_v14 = vld [vmem:[%s3902_s11] sm:$0xff]  ;;  %v2046_v56 = vld [vmem:[%s3902_s11 + $0x8] sm:$0xff] }
 0x4cb   : > { %2660 = vmatprep.subr.bf16.mxu1 %v2659_v17 }
 0x4cc   : > { %1649 = vperm.xlu0 %2831, %v2879_v16   ;;  %2662 = vmatpush3.bf16.msra.mxu1 %v2659_v17  ;;  %v2047_v17 = vld [vmem:[%s3902_s11 + $0x10] sm:$0xff] }
 0x4cd   : > { %2664 = vmatprep.subr.bf16.mxu1 %v2663_v33 }
 0x4d0   : > { %2666 = vmatpush3.bf16.msra.mxu1 %v2663_v33  ;;  %v2691_v33 = vpack.c.bf16 %v2050_v62, %v2049_v28 }
 0x4eb   : > { %v1267_v23 = vpop.f32.mrb[8].mxu0 }
 0x4ec   : > { %v1289_v26 = vadd.f32 %v1287_v22, %v1267_v23  ;;  %v2557_v29 = vpop.f32.mrb[9].mxu0 }
 0x4ed   : > { %v1270_v31 = vpop.f32.mrb[10].mxu0 }
 0x4ee   : > { %1291 = vst.msk [vmem:[#allocation5 + $0x10] sm:$0xff] %vm776_vm1, %v1289_v26  ;;  %v1290_v32 = vadd.f32 %v1288_v24, %v1270_v31  ;;  %v2558_v34 = vpop.f32.mrb[11].mxu0 }
 0x4f0   : > { %1292 = vst.msk [vmem:[#allocation5 + $0x18] sm:$0xff] %vm776_vm1, %v1290_v32 }
 0x4f3   : > { %v1435_v54 = vpop.f32.mrb[12].mxu0 }
 0x4f4   : > { %v1457_v57 = vadd.f32 %v1455_v49, %v1435_v54  ;;  %v2569_v58 = vpop.f32.mrb[13].mxu0 }
 0x4f5   : > { %v1438_v60 = vpop.f32.mrb[14].mxu0  ;;  %v1654_v12 = vld [vmem:[#allocation5 + $0x10] sm:$0xff] }
 0x4f6   : > { %1459 = vst.msk [vmem:[#allocation5 + $0x20] sm:$0xff] %vm776_vm1, %v1457_v57  ;;  %v1458_v61 = vadd.f32 %v1456_v55, %v1438_v60  ;;  %v2570_v63 = vpop.f32.mrb[15].mxu0 }
 0x4f7   : > { %v1655_v59 = vld [vmem:[#allocation5 + $0x18] sm:$0xff] }
 0x4f8   : > { %1460 = vst.msk [vmem:[#allocation5 + $0x28] sm:$0xff] %vm776_vm1, %v1458_v61 }
 0x4fb   : > { %v1603_v3 = vpop.f32.mrb[16].mxu0 }
 0x4fc   : > { %v1625_v6 = vadd.f32 %v1623_v2, %v1603_v3  ;;  %v2581_v10 = vpop.f32.mrb[17].mxu0 }
 0x4fd   : > { %v1606_v11 = vpop.f32.mrb[18].mxu0  ;;  %v1672_v36 = vld [vmem:[#allocation5 + $0x20] sm:$0xff]  ;;  %v1879_v10 = vld [vmem:[#allocation15 + $0x10] sm:$0xff] }
 0x4fe   : > { %1627 = vst.msk [vmem:[#allocation5 + $0x30] sm:$0xff] %vm776_vm1, %v1625_v6  ;;  %v1626_v50 = vadd.f32 %v1624_v5, %v1606_v11  ;;  %v2582_v8 = vpop.f32.mrb[19].mxu0  ;;  %v1877_v5 = vld [vmem:[#allocation15] sm:$0xff]  ;;  %v1878_v6 = vld [vmem:[#allocation15 + $0x8] sm:$0xff] }
 0x4ff   : > { %v1673_v41 = vld [vmem:[#allocation5 + $0x28] sm:$0xff]  ;;  %v2667_v11 = vpack.c.bf16 %v1878_v6, %v1877_v5 }
 0x500   : > { %1628 = vst.msk [vmem:[#allocation5 + $0x38] sm:$0xff] %vm776_vm1, %v1626_v50  ;;  %v1880_v50 = vld [vmem:[#allocation15 + $0x18] sm:$0xff] }
 0x501   : > { %v2671_v8 = vpack.c.bf16 %v1880_v50, %v1879_v10  ;;  %2668 = vmatprep.subr.bf16.mxu0 %v2667_v11 }
 0x502   : > { %2670 = vmatpush3.bf16.msra.mxu0 %v2667_v11 }
 0x503   : > { %2672 = vmatprep.subr.bf16.mxu0 %v2671_v8 }
 0x505   : > { %v1690_v46 = vld [vmem:[#allocation5 + $0x30] sm:$0xff] }
 0x506   : > { %2674 = vmatpush3.bf16.msra.mxu0 %v2671_v8 }
 0x507   : > { %v1691_v48 = vld [vmem:[#allocation5 + $0x38] sm:$0xff] }
 0x52f   : > { %v1663_v53 = vpop.permute.xlu1 %1662 }
 0x530   : > { %v1670_v13 = vmul.f32 %v1663_v53, %v1654_v12  ;;  %v1873_v53 = vld [vmem:[#allocation14] sm:$0xff]  ;;  %v1874_v12 = vld [vmem:[#allocation14 + $0x8] sm:$0xff] }
 0x532   : > { %1710 = vrot.lane.b32.xlu1 %v1670_v13, %s3167_s24  ;;  %v2675_v13 = vpack.c.bf16 %v1874_v12, %v1873_v53 }
 0x533   : > { %v1668_v21 = vpop.permute.xlu0 %1667 }
 0x534   : > { %v1671_v25 = vmul.f32 %v1668_v21, %v1655_v59  ;;  %2676 = vmatprep.subr.bf16.mxu0 %v2675_v13  ;;  %v2683_v59 = vpack.c.bf16 %v2046_v56, %v2045_v14  ;;  %v2048_v21 = vld [vmem:[%s3902_s11 + $0x18] sm:$0xff] }
 0x536   : > { %1712 = vrot.lane.b32.xlu0 %v1671_v25, %s3167_s24  ;;  %v2687_v25 = vpack.c.bf16 %v2048_v21, %v2047_v17  ;;  %2684 = vmatprep.subr.bf16.mxu1 %v2683_v59 }
 0x537   : > { %v1681_v39 = vpop.permute.xlu1 %1680 }
 0x538   : > { %v1688_v1 = vmul.f32 %v1681_v39, %v1672_v36 }
 0x53a   : > { %1718 = vrot.lane.b32.xlu1 %v1688_v1, %s3168_s12 }
 0x53b   : > { %v1686_v43 = vpop.permute.xlu0 %1685 }
 0x53c   : > { %v1689_v44 = vmul.f32 %v1686_v43, %v1673_v41 }
 0x53e   : > { %1720 = vrot.lane.b32.xlu0 %v1689_v44, %s3168_s12 }
 0x53f   : > { %v1699_v47 = vpop.permute.xlu1 %1698 }
 0x540   : > { %v1706_v51 = vmul.f32 %v1699_v47, %v1690_v46 }
 0x542   : > { %1726 = vrot.lane.b32.xlu1 %v1706_v51, %s3169_s23 }
 0x543   : > { %v1109_v45 = vpop.permute.xlu1 %1108  ;;  %v1704_v52 = vpop.permute.xlu0 %1703 }
 0x544   : > { %v1116_v16 = vmul.f32 %v1109_v45, %v1104_v42  ;;  %v1707_v19 = vmul.f32 %v1704_v52, %v1691_v48 }
 0x546   : > { %v1118_v18 = vadd.f32 %v1116_v16, %v3737_v27  ;;  %1728 = vrot.lane.b32.xlu0 %v1707_v19, %s3169_s23 }
 0x547   : > { %v1114_v20 = vpop.permute.xlu0 %1113  ;;  %v1645_v24 = vpop.permute.xlu1 %1644 }
 0x548   : > { %1120 = vst.msk [vmem:[#allocation5] sm:$0xff] %vm776_vm1, %v1118_v18  ;;  %v1117_v22 = vmul.f32 %v1114_v20, %v1105_v15  ;;  %v2421_v20 = vld [vmem:[%s3898_s7] ss:$0 sm:$0xff] }
 0x54a   : > { %v1119_v23 = vadd.f32 %v1117_v22, %v3739_v30 }
 0x54b   : > { %v1650_v26 = vpop.permute.xlu0 %1649 }
 0x54c   : > { %1121 = vst.msk [vmem:[#allocation5 + $0x8] sm:$0xff] %vm776_vm1, %v1119_v23 }
 0x54f   : > { %v1636_v31 = vld [vmem:[#allocation5] sm:$0xff] }
 0x550   : > { %v1652_v35 = vmul.f32 %v1645_v24, %v1636_v31  ;;  %v2422_v24 = vld [vmem:[%s3899_s8] ss:$0 sm:$0xff]  ;;  %v1875_v31 = vld [vmem:[#allocation14 + $0x10] sm:$0xff] }
 0x553   : > { %v1637_v37 = vld [vmem:[#allocation5 + $0x8] sm:$0xff] }
 0x554   : > { %v1653_v54 = vmul.f32 %v1650_v26, %v1637_v37 }
 0x5a4   : > { %v1711_v29 = vpop.permute.xlu1 %1710 }
 0x5a5   : > { %v1732_v27 = vsel %vm776_vm1, %v1652_v35, %v1711_v29 }
 0x5a8   : > { %v1713_v32 = vpop.permute.xlu0 %1712 }
 0x5a9   : > { %v1733_v30 = vsel %vm776_vm1, %v1653_v54, %v1713_v32  ;;  %v1876_v32 = vld [vmem:[#allocation14 + $0x18] sm:$0xff]  ;;  %v2052_v54 = vld [vmem:[%s3902_s11 + $0x38] sm:$0xff] }
 0x5ac   : > { %v1719_v34 = vpop.permute.xlu1 %1718 }
 0x5ad   : > { %v1734_v38 = vsel %vm1013_vm3, %v1732_v27, %v1719_v34  ;;  %v2679_v27 = vpack.c.bf16 %v1876_v32, %v1875_v31 }
 0x5b0   : > { %v1721_v40 = vpop.permute.xlu0 %1720 }
 0x5b1   : > { %v1735_v57 = vsel %vm1013_vm3, %v1733_v30, %v1721_v40  ;;  %v1635_v40 = vld [vmem:[%s3483_s25 + $0x8] sm:$0xff] }
 0x5b4   : > { %v1727_v49 = vpop.permute.xlu1 %1726 }
 0x5b5   : > { %v1737_v55 = vsel %vm1736_vm5, %v1734_v38, %v1727_v49  ;;  %v3808_v38 = vld [vmem:[%s3483_s25] sm:$0xff]  ;;  %v2051_v49 = vld [vmem:[%s3902_s11 + $0x30] sm:$0xff]  ;;  %s3943_s25 = sld [smem:[#allocation24_spill]] }
 0x5b6   : > { %2591 = vmatprep.mubr.msk.f32.mxu1 %vm675_vm0, %v1737_v55  ;;  %v2695_v55 = vpack.c.bf16 %v2052_v54, %v2051_v49 }
 0x5b8   : > { %v1729_v58 = vpop.permute.xlu0 %1728 }
 0x5b9   : > { %v1738_v60 = vsel %vm1736_vm5, %v1735_v57, %v1729_v58 }
 0x5ba   : > { %2592 = vmatmul.mubr.msk.f32.vlgmr.msra.gmra.mrb[2].mxu1 %vm675_vm0, %v1738_v60 }
 0x5bb   : > { %2686 = vmatpush3.bf16.msra.mxu1 %v2683_v59  ;;  %s630_s27 = sand.u32 1, %s3943_s25  }
 0x5bc   : > { %2688 = vmatprep.subr.bf16.mxu1 %v2687_v25  ;;  %s2398_s20 = sshll.u32 %s630_s27, 4  ;;  %s3844_s16 = scalar_lea.sflag [#allocation8], %s630_s27 }
 0x5bd   : > { %s632_s22 = scalar_lea.vmem [#allocation17], %s2398_s20  ;;  %s3170_s20 = smov [#allocation17]  }
 0x5be   : > { %s2203_s26 = sshll.u32 %s632_s22, 4  ;;  %s3060_s29 = sshll.u32 %s3170_s20, 4  ;;  %s3840_s26 = int_to_ptr.vmem [resolvable:$true] %s2203_s26  ;;  %s3061_s29 = int_to_ptr.vmem [resolvable:$false] %s3060_s29 }
 0x5bf   : > { %2690 = vmatpush3.bf16.msra.mxu1 %v2687_v25  ;;  %s3056_s25 = scalar_lea.vmem %s3840_s26, 256  ;;  %s3062_s28 = scalar_lea.vmem %s3061_s29, 512 }
 0x5c0   : > { %2692 = vmatprep.subr.bf16.mxu1 %v2691_v33  ;;  %p3057_p8 = scmp.ne.s32.totalorder %s3840_s26, %s3056_s25  ;;  %p3063_p2 = scmp.lt.s32.totalorder %s3840_s26, %s3061_s29 }
 0x5c1   : > { %p3064_p3 = scmp.lt.s32.totalorder %s3062_s28, %s3056_s25 }
 0x5c2   : > { %p3058_p11 = pnand %p3057_p8, %p3949_p10 }
 0x5c3   : > { %2694 = vmatpush3.bf16.msra.mxu1 %v2691_v33  ;;  %v2429_v33 = vld [vmem:[%s3944_s14] ss:$0 sm:$0xff]  ;;  %p3065_p5 = por %p3064_p3, %p3063_p2 }
 0x5c4   : > { %2696 = vmatprep.subr.bf16.mxu1 %v2695_v55  ;;  %p3059_p0 = pneg %p3058_p11 }
 0x5c6   : > { %p3066_p6 = pnand %p3065_p5, %p3059_p0 }
 0x5c7   : > { %2698 = vmatpush3.bf16.msra.mxu1 %v2695_v55 }
 0x68d   : > { %v3773_v61 = vpop.f32.mrb[2].mxu1 }
 0x68e   : > { %v1815_v63 = vpop.f32.mrb[3].mxu1  ;;  %v1829_v0 = vsel %vm675_vm0, %v3773_v61, 0.0  ;;  %v1836_v9 = vmul.f32 %v3773_v61, %v3773_v61 }
 0x68f   : > { %1830 = vadd.xlane.f32.xlu0 %v1829_v0  ;;  %v1826_v4 = vsel %vm675_vm0, %v1815_v63, 0.0  ;;  %v1835_v7 = vmul.f32 %v1815_v63, %v1815_v63 }
 0x690   : > { %1827 = vadd.xlane.f32.xlu1 %v1826_v4  ;;  %v1840_v3 = vsel %vm675_vm0, %v1836_v9, 0.0 }
 0x691   : > { %v1837_v2 = vsel %vm675_vm0, %v1835_v7, 0.0 }
 0x693   : > { %1838 = vadd.xlane.f32.xlu0 %v1837_v2 }
 0x694   : > { %1841 = vadd.xlane.f32.xlu1 %v1840_v3 }
 0x71c   : > { %v1831_v36 = vpop.xlane.xlu0 %1830 }
 0x71d   : > { %v1828_v39 = vpop.xlane.xlu1 %1827  ;;  %v1834_v1 = vmul.f32 0.03125, %v1831_v36 }
 0x71e   : > { %v1833_v41 = vmul.f32 0.03125, %v1828_v39 }
 0x71f   : > { %v1846_v51 = vmul.f32 %v1834_v1, %v1834_v1  ;;  %v1850_v18 = vsub.f32 %v3773_v61, %v1834_v1  ;;  %v2430_v1 = vld [vmem:[%s3945_s13] ss:$0 sm:$0xff] }
 0x720   : > { %v1845_v43 = vmul.f32 %v1833_v41, %v1833_v41  ;;  %v1839_v44 = vpop.xlane.xlu0 %1838  ;;  %v1849_v19 = vsub.f32 %v1815_v63, %v1833_v41 }
 0x721   : > { %v1843_v46 = vmul.f32 0.03125, %v1839_v44  ;;  %v1842_v47 = vpop.xlane.xlu1 %1841 }
 0x722   : > { %v1844_v42 = vmul.f32 0.03125, %v1842_v47 }
 0x723   : > { %v1847_v45 = vsub.f32 %v1843_v46, %v1845_v43 }
 0x724   : > { %v1848_v48 = vsub.f32 %v1844_v42, %v1846_v51 }
 0x725   : > { %v1851_v52 = vadd.f32 1e-05, %v1847_v45 }
 0x726   : > { %v1852_v16 = vadd.f32 1e-05, %v1848_v48 }
 0x727   : > { %2880 = vrsqrt.f32 %v1851_v52 }
 0x728   : > { %2882 = vrsqrt.f32 %v1852_v16 }
 0x731   : > { %v2881_v15 = vpop.eup %2880 }
 0x732   : > { %v2883_v22 = vpop.eup %2882  ;;  %v1855_v23 = vmul.f32 %v2881_v15, %v1849_v19 }
 0x733   : > { %v1856_v26 = vmul.f32 %v2883_v22, %v1850_v18 }
 0x734   : > { %v1863_v29 = vmul.f32 %v2421_v20, %v1855_v23 }
 0x735   : > { %v1864_v34 = vmul.f32 %v2421_v20, %v1856_v26 }
 0x736   : > { %v1871_v35 = vadd.f32 %v2422_v24, %v1863_v29 }
 0x737   : > { %v1872_v37 = vadd.f32 %v2422_v24, %v1864_v34 }
 0x738   : > { %2602 = vmatprep.mubr.msk.f32.mxu0 %vm675_vm0, %v1871_v35 }
 0x739   : > { %2603 = vmatmul.mubr.msk.f32.vlgmr.msra.gmra.mrb[20].mxu0 %vm675_vm0, %v1872_v37 }
 0x73a   : > { %2678 = vmatpush3.bf16.msra.mxu0 %v2675_v13  ;;  %2613 = vmatprep.mubr.msk.f32.mxu0 %vm675_vm0, %v3808_v38 }
 0x73b   : > { %2680 = vmatprep.subr.bf16.mxu0 %v2679_v27 }
 0x73e   : > { %2682 = vmatpush3.bf16.msra.mxu0 %v2679_v27 }
 0x741   : > { %2614 = vmatmul.mubr.msk.f32.vlgmr.msra.gmra.mrb[20].mxu0 %vm675_vm0, %v1635_v40 }
 0x814   : > { %v2615_v30 = vpop.f32.mrb[20].mxu0 }
 0x815   : > { %v2034_v57 = vpop.f32.mrb[21].mxu0  ;;  %v2044_v60 = vmax.f32 %v2615_v30, 0.0 }
 0x816   : > { %v2043_v58 = vmax.f32 %v2034_v57, 0.0 }
 0x818   : > { %2632 = vmatprep.mubr.msk.f32.mxu1 %vm2053_vm6, %v2043_v58 }
 0x819   : > { %2633 = vmatmul.mubr.msk.f32.vlgmr.msra.gmra.mrb[20].mxu1 %vm2053_vm6, %v2044_v60 }
 0x8ec   : > { %v2634_v61 = vpop.f32.mrb[20].mxu1 }
 0x8ed   : > { %v2126_v63 = vpop.f32.mrb[21].mxu1  ;;  %v2140_v0 = vsel %vm675_vm0, %v2634_v61, 0.0  ;;  %v2146_v4 = vmul.f32 %v2634_v61, %v2634_v61 }
 0x8ee   : > { %v2145_v7 = vmul.f32 %v2126_v63, %v2126_v63  ;;  %2141 = vadd.xlane.f32.xlu1 %v2140_v0  ;;  %v2137_v9 = vsel %vm675_vm0, %v2126_v63, 0.0 }
 0x8ef   : > { %2138 = vadd.xlane.f32.xlu0 %v2137_v9  ;;  %v2150_v2 = vsel %vm675_vm0, %v2146_v4, 0.0 }
 0x8f0   : > { %v2147_v3 = vsel %vm675_vm0, %v2145_v7, 0.0 }
 0x8f2   : > { %2151 = vadd.xlane.f32.xlu1 %v2150_v2 }
 0x8f3   : > { %2148 = vadd.xlane.f32.xlu0 %v2147_v3 }
 0x97b   : > { %v2142_v5 = vpop.xlane.xlu1 %2141 }
 0x97c   : > { %v2144_v6 = vmul.f32 0.03125, %v2142_v5  ;;  %v2139_v10 = vpop.xlane.xlu0 %2138 }
 0x97d   : > { %v2143_v11 = vmul.f32 0.03125, %v2139_v10 }
 0x97e   : > { %v2156_v8 = vmul.f32 %v2144_v6, %v2144_v6  ;;  %v2160_v25 = vsub.f32 %v2634_v61, %v2144_v6 }
 0x97f   : > { %v2152_v50 = vpop.xlane.xlu1 %2151  ;;  %v2155_v13 = vmul.f32 %v2143_v11, %v2143_v11  ;;  %v2159_v62 = vsub.f32 %v2126_v63, %v2143_v11 }
 0x980   : > { %v2154_v53 = vmul.f32 0.03125, %v2152_v50  ;;  %v2149_v12 = vpop.xlane.xlu0 %2148 }
 0x981   : > { %v2153_v14 = vmul.f32 0.03125, %v2149_v12 }
 0x982   : > { %v2158_v56 = vsub.f32 %v2154_v53, %v2156_v8 }
 0x983   : > { %v2157_v17 = vsub.f32 %v2153_v14, %v2155_v13 }
 0x984   : > { %v2162_v59 = vadd.f32 1e-05, %v2158_v56 }
 0x985   : > { %v2161_v21 = vadd.f32 1e-05, %v2157_v17 }
 0x986   : > { %2884 = vrsqrt.f32 %v2162_v59 }
 0x987   : > { %2886 = vrsqrt.f32 %v2161_v21 }
 0x990   : > { %v2885_v28 = vpop.eup %2884 }
 0x991   : > { %v2887_v36 = vpop.eup %2886  ;;  %v2166_v39 = vmul.f32 %v2885_v28, %v2160_v25 }
 0x992   : > { %v2165_v41 = vmul.f32 %v2887_v36, %v2159_v62 }
 0x993   : > { %v2174_v43 = vmul.f32 %v2429_v33, %v2166_v39 }
 0x994   : > { %v2173_v44 = vmul.f32 %v2429_v33, %v2165_v41 }
 0x995   : > { %v2182_v46 = vadd.f32 %v2430_v1, %v2174_v43 }
 0x996   : > { %v2181_v47 = vadd.f32 %v2430_v1, %v2173_v44 }
 0x997   : > { %v2184_v51 = vadd.f32 %v2182_v46, %v1635_v40 }
 0x998   : > { %v2183_v42 = vadd.f32 %v2181_v47, %v3808_v38 }
 0x999   : > { %2186 = vst.msk [vmem:[%s632_s22 + $0x8] sm:$0xff] %vm675_vm0, %v2184_v51 }
 0x99a   : > { %2185 = vst.msk [vmem:[%s632_s22] sm:$0xff] %vm675_vm0, %v2183_v42 }
 0x99b   : > { %3069 = shalt.err (!%p3066_p6)
}
 0x99c   : > { %s3070_s27 = scalar_lea.hbm %s3837_s18, 256  ;;  %s3074_s4 = scalar_lea.hbm %s3948_s21, 512 }
 0x99d   : > { %p3071_p7 = scmp.ne.s32.totalorder %s3837_s18, %s3070_s27  ;;  %p3075_p4 = scmp.lt.u32.totalorder %s3837_s18, %s3948_s21 }
 0x99e   : > { %p3076_p1 = scmp.lt.u32.totalorder %s3074_s4, %s3070_s27  ;;  %p3078_p8 = scmp.lt.u32.totalorder %s3070_s27, %s3837_s18 }
 0x99f   : > { %p3072_p9 = pnand %p3071_p7, %p3949_p10 }
 0x9a0   : > { %p3077_p13 = por %p3076_p1, %p3075_p4 }
 0x9a1   : > { %p3073_p12 = pneg %p3072_p9 }
 0x9a2   : > { %p3079_p11 = por %p3078_p8, %p3077_p13 }
 0x9a4   : > { %p3080_p0 = pnand %p3079_p11, %p3073_p12 }
 0x9a6   : > { %3083 = shalt.err (!%p3080_p0)
}
 0x9a7   : > { %s3171_s22 = smov 128  }
 0x9a8   : > { %2725 = dma.vmem_to_hbm [thread:$0]  (%p3949_p10), %s3840_s26, 256, %s3837_s18, %s3844_s16, %s3171_s22, %s3171_s22, %s3167_s24  }
 0x9a9 PF: > { %s3950_s12 = sld [smem:[#allocation27_spill]]  ;;  %s3951_s23 = sld [smem:[#allocation23_spill]] }
 0x9aa   : > { %s3952_s30 = sld [smem:[#allocation30_spill]] }
 0x9af   : > { %p2762_p2 = scmp.ge.s32.totalorder %s3950_s12, 2  ;;  %s2218_s25 = sand.u32 1, %s3951_s23  }
 0x9b0   : > { %p3953_p3 = scmp.ne.s32.totalorder %s3952_s30, 0  ;;  %s2219_s20 = scalar_lea.sflag [#allocation8], %s2218_s25 }
 0x9b2   : > { %p2747_p5 = pnand %p2762_p2, %p3953_p3 }
 0x9b4   : > { %3125 = dma.done.wait (!%p2747_p5), %s2219_s20, 256  }
 0x9b5   : > { %3127 = vsyncadd (!%p2747_p5), %s2219_s20, 4294967040  ;;  %s31_s18 = sadd.s32 1, %s3950_s12   ;;  %s3954_s29 = sld [smem:[#allocation24_spill]] }
 0x9b6   : > { %p28_p6 = scmp.ge.s32.totalorder %s31_s18, 4   ;;  %s3955_s30 = sld [smem:[#allocation25_spill]] }
 0x9b7   : > { %s3956_s15 = sld [smem:[#allocation31_spill]]  ;;  %s3957_s16 = sld [smem:[#allocation26_spill]] }
 0x9b8   : > { %s3958_s17 = sld [smem:[#allocation28_spill]]  ;;  %30 = sbr.rel (!%p28_p6) target bundleno = 13 (0xd), region = 159 }
 0x9bf   :  { %2224 = vsyncpa [#allocation7], 1 }
 0x9c0   :  { %2226 = vsyncpa [#allocation7 + $0x1], 1 }
 0x9c1   :  { %2227 = vsyncpa [#allocation10], 1 }
 0x9c2   :  { %2228 = vsyncpa [#allocation13], 1 }
 0x9c3   :  { %2229 = vsyncpa [#allocation16], 1 }
 0x9c4   :  { %2230 = vsyncpa [#allocation8], 1 }
 0x9c5   :  { %2232 = vsyncpa [#allocation8 + $0x1], 1 }

</bundles_post_ra>
